<compile_context>
chip_gen: v7x
topology: tpu7x:2x2x1
jax: 0.10.0
libtpu: 0.0.40
codegen_flags: <defaults>
</compile_context>

<pallas_src>
import jax
import jax.numpy as jnp
from jax import lax
from jax.experimental import pallas as pl
from jax.experimental.pallas import tpu as pltpu

C_IN = 3
C_OUT = 3
K = 3


def _fused_kernel(x_ref, w2_ref, b2_ref, w1_ref, b1_ref,
                  xcat_ref, y_ref, xpad_ref):
    """Single fused kernel (everything fits comfortably in VMEM):
         y    = conv2d(x, w2, b2)                 # 3x3, stride 1, pad 1
         x_r  = x[..., :W/2] + x[..., W/2:]
         z    = conv1d_along_W(y, w1, b1)         # k=3, stride 1, pad 1
         xcat = concat([x_r, z, x[..., W/2:]], axis=-1)
    Channel / kernel-tap loops are tiny (3) and unrolled at trace time; weights
    live in SMEM and are read as scalars that broadcast-multiply (N,H,W) slabs.
    """
    N, C, H, W = x_ref.shape
    Hp, Wp = H + 2, W + 2
    half = W // 2

    # ---- in-kernel zero padding of x: zero ONLY the 1-wide halo, then copy
    # the interior once (per-channel slabs kept live as values for later use).
    xpad_ref[:, :, 0:1, :] = jnp.zeros((N, C, 1, Wp), jnp.float32)
    xpad_ref[:, :, Hp - 1:Hp, :] = jnp.zeros((N, C, 1, Wp), jnp.float32)
    xpad_ref[:, :, :, 0:1] = jnp.zeros((N, C, Hp, 1), jnp.float32)
    xpad_ref[:, :, :, Wp - 1:Wp] = jnp.zeros((N, C, Hp, 1), jnp.float32)

    xs = []
    for ci in range(C_IN):
        xv = x_ref[:, ci, :, :]                       # (N, H, W)
        xs.append(xv)
        xpad_ref[:, ci, 1:1 + H, 1:1 + W] = xv

    # ---- conv2d (3x3, pad 1): taps outermost, output channel innermost so
    # each of the 27 shifted windows is loaded exactly once.  Bias folded into
    # the accumulator init.
    accs = [jnp.full((N, H, W), b2_ref[co], jnp.float32) for co in range(C_OUT)]
    for ci in range(C_IN):
        for kh in range(K):
            for kw in range(K):
                win = xpad_ref[:, ci, kh:kh + H, kw:kw + W]
                for co in range(C_OUT):
                    wv = w2_ref[((co * C_IN + ci) * K + kh) * K + kw]
                    accs[co] = accs[co] + wv * win

    for co in range(C_OUT):
        y_ref[:, co, :, :] = accs[co]

    # ---- conv1d along W (k=3, pad 1), fed directly from the conv2d
    # accumulators still live in vregs (no ypad scratch, no reload of y).
    # zc: center tap (full width, bias folded in); zl/zr: boundary-clipped
    # shifted taps (width W-1).  Input-channel slices hoisted out of the
    # output-channel loop.
    zc = [jnp.full((N, H, W), b1_ref[co], jnp.float32) for co in range(C_OUT)]
    zl = [jnp.zeros((N, H, W - 1), jnp.float32) for _ in range(C_OUT)]
    zr = [jnp.zeros((N, H, W - 1), jnp.float32) for _ in range(C_OUT)]
    for ci in range(C_IN):
        yv = accs[ci]
        yv_l = yv[:, :, 0:W - 1]          # source for taps reading y[w-1]
        yv_r = yv[:, :, 1:W]              # source for taps reading y[w+1]
        for co in range(C_OUT):
            base = (co * C_IN + ci) * K
            zc[co] = zc[co] + w1_ref[base + 1] * yv
            zl[co] = zl[co] + w1_ref[base + 0] * yv_l
            zr[co] = zr[co] + w1_ref[base + 2] * yv_r

    # ---- pointwise add + concat: x_cat = [x_r + x_c | z | x_c] along W
    for co in range(C_OUT):
        xv = xs[co]
        x_c = xv[:, :, half:W]
        xcat_ref[:, co, :, 0:half] = xv[:, :, 0:half] + x_c
        xcat_ref[:, co, :, half + W:2 * W] = x_c
        xcat_ref[:, co, :, half:half + W] = zc[co]
        # add the shifted boundary-clipped taps into the stored center term
        xcat_ref[:, co, :, half + 1:half + W] = (
            xcat_ref[:, co, :, half + 1:half + W] + zl[co])
        xcat_ref[:, co, :, half:half + W - 1] = (
            xcat_ref[:, co, :, half:half + W - 1] + zr[co])


@jax.jit
def model_forward(x, w2, b2, w1, b1):
    N, C, H, W = x.shape
    assert C == C_IN and W % 2 == 0

    smem = pl.BlockSpec(memory_space=pltpu.MemorySpace.SMEM)
    vmem = pl.BlockSpec(memory_space=pltpu.MemorySpace.VMEM)

    x_cat, y = pl.pallas_call(
        _fused_kernel,
        out_shape=(
            jax.ShapeDtypeStruct((N, C_OUT, H, 2 * W), jnp.float32),  # x_cat
            jax.ShapeDtypeStruct((N, C_OUT, H, W), jnp.float32),      # conv2d out
        ),
        in_specs=[vmem, smem, smem, smem, smem],
        out_specs=(vmem, vmem),
        scratch_shapes=[pltpu.VMEM((N, C_IN, H + 2, W + 2), jnp.float32)],
    )(x, w2.reshape(-1), b2, w1.reshape(-1), b1)
    return x_cat, y


def ref_forward(x, w2, b2, w1, b1):
    """Pure-JAX reference of the same (repaired) semantics."""
    N, C, H, W = x.shape
    half = W // 2
    x_r, x_c = x[..., :half], x[..., half:]
    y = lax.conv_general_dilated(
        x, w2, window_strides=(1, 1), padding=((1, 1), (1, 1)),
        dimension_numbers=("NCHW", "OIHW", "NCHW")) + b2.reshape(1, -1, 1, 1)
    x_r = x_r + x_c
    y1 = jnp.transpose(y, (0, 2, 1, 3)).reshape(N * H, C_OUT, W)
    z = lax.conv_general_dilated(
        y1, w1, window_strides=(1,), padding=((1, 1),),
        dimension_numbers=("NCH", "OIH", "NCH")) + b1.reshape(1, -1, 1)
    z = z.reshape(N, H, C_OUT, W).transpose(0, 2, 1, 3)
    x_c2 = jnp.concatenate([z, x_c], axis=-1)
    x_cat = jnp.concatenate([x_r, x_c2], axis=-1)
    return x_cat, y


if __name__ == "__main__":
    key = jax.random.PRNGKey(0)
    kx, kw2, kb2, kw1, kb1 = jax.random.split(key, 5)

    N, H, W = 2, 4, 6
    x = jax.random.normal(kx, (N, C_IN, H, W), jnp.float32)

    # Deterministic PyTorch-style init: U(-1/sqrt(fan_in), 1/sqrt(fan_in))
    bnd2 = 1.0 / (C_IN * K * K) ** 0.5
    w2 = jax.random.uniform(kw2, (C_OUT, C_IN, K, K), jnp.float32, -bnd2, bnd2)
    b2 = jax.random.uniform(kb2, (C_OUT,), jnp.float32, -bnd2, bnd2)
    bnd1 = 1.0 / (C_IN * K) ** 0.5
    w1 = jax.random.uniform(kw1, (C_OUT, C_IN, K), jnp.float32, -bnd1, bnd1)
    b1 = jax.random.uniform(kb1, (C_OUT,), jnp.float32, -bnd1, bnd1)

    x_cat, y = jax.block_until_ready(model_forward(x, w2, b2, w1, b1))

    # correctness check against pure-JAX reference
    x_cat_ref, y_ref = ref_forward(x, w2, b2, w1, b1)
    assert x_cat.shape == (N, C_OUT, H, 2 * W)
    assert y.shape == (N, C_OUT, H, W)
    assert jnp.allclose(y, y_ref, atol=1e-4), float(jnp.max(jnp.abs(y - y_ref)))
    assert jnp.allclose(x_cat, x_cat_ref, atol=1e-4), float(
        jnp.max(jnp.abs(x_cat - x_cat_ref)))

    print("KERNEL_OK")
</pallas_src>

<mosaic_0001>
module attributes {stable_mosaic.version = 11 : i64} {
  func.func @_fused_kernel(%arg0: memref<2x3x4x6xf32, #tpu.memory_space<vmem>>, %arg1: memref<81xf32, #tpu.memory_space<smem>>, %arg2: memref<3xf32, #tpu.memory_space<smem>>, %arg3: memref<27xf32, #tpu.memory_space<smem>>, %arg4: memref<3xf32, #tpu.memory_space<smem>>, %arg5: memref<2x3x4x12xf32, #tpu.memory_space<vmem>>, %arg6: memref<2x3x4x6xf32, #tpu.memory_space<vmem>>, %arg7: memref<2x3x6x8xf32, #tpu.memory_space<vmem>>) attributes {dimension_semantics = [], scalar_prefetch = 0 : i64, scratch_operands = 1 : i64, tpu.core_type = #tpu.core_type<tc>} {
    %cst = arith.constant 0.000000e+00 : f32
    %0 = vector.broadcast %cst : f32 to vector<2x3x1x8xf32>
    %c0 = arith.constant 0 : index
    %c0_0 = arith.constant 0 : index
    %c0_1 = arith.constant 0 : index
    %c0_2 = arith.constant 0 : index
    %1 = vector.load %arg7[%c0, %c0_0, %c0_1, %c0_2] : memref<2x3x6x8xf32, #tpu.memory_space<vmem>>, vector<2x3x1x8xf32>
    tpu.vector_store %arg7[%c0, %c0_0, %c0_1, %c0_2], %0 {strides = array<i32>} : memref<2x3x6x8xf32, #tpu.memory_space<vmem>>, vector<2x3x1x8xf32>,
    %cst_3 = arith.constant 0.000000e+00 : f32
    %2 = vector.broadcast %cst_3 : f32 to vector<2x3x1x8xf32>
    %c0_4 = arith.constant 0 : index
    %c0_5 = arith.constant 0 : index
    %c5 = arith.constant 5 : index
    %c0_6 = arith.constant 0 : index
    %3 = vector.load %arg7[%c0_4, %c0_5, %c5, %c0_6] : memref<2x3x6x8xf32, #tpu.memory_space<vmem>>, vector<2x3x1x8xf32>
    tpu.vector_store %arg7[%c0_4, %c0_5, %c5, %c0_6], %2 {strides = array<i32>} : memref<2x3x6x8xf32, #tpu.memory_space<vmem>>, vector<2x3x1x8xf32>,
    %cst_7 = arith.constant 0.000000e+00 : f32
    %4 = vector.broadcast %cst_7 : f32 to vector<2x3x6x1xf32>
    %c0_8 = arith.constant 0 : index
    %c0_9 = arith.constant 0 : index
    %c0_10 = arith.constant 0 : index
    %c0_11 = arith.constant 0 : index
    %5 = vector.load %arg7[%c0_8, %c0_9, %c0_10, %c0_11] : memref<2x3x6x8xf32, #tpu.memory_space<vmem>>, vector<2x3x6x1xf32>
    tpu.vector_store %arg7[%c0_8, %c0_9, %c0_10, %c0_11], %4 {strides = array<i32>} : memref<2x3x6x8xf32, #tpu.memory_space<vmem>>, vector<2x3x6x1xf32>,
    %cst_12 = arith.constant 0.000000e+00 : f32
    %6 = vector.broadcast %cst_12 : f32 to vector<2x3x6x1xf32>
    %c0_13 = arith.constant 0 : index
    %c0_14 = arith.constant 0 : index
    %c0_15 = arith.constant 0 : index
    %c7 = arith.constant 7 : index
    %7 = vector.load %arg7[%c0_13, %c0_14, %c0_15, %c7] : memref<2x3x6x8xf32, #tpu.memory_space<vmem>>, vector<2x3x6x1xf32>
    tpu.vector_store %arg7[%c0_13, %c0_14, %c0_15, %c7], %6 {strides = array<i32>} : memref<2x3x6x8xf32, #tpu.memory_space<vmem>>, vector<2x3x6x1xf32>,
    %c0_16 = arith.constant 0 : index
    %c0_17 = arith.constant 0 : index
    %c0_18 = arith.constant 0 : index
    %c0_19 = arith.constant 0 : index
    %8 = vector.load %arg0[%c0_16, %c0_17, %c0_18, %c0_19] : memref<2x3x4x6xf32, #tpu.memory_space<vmem>>, vector<2x1x4x6xf32>
    %9 = vector.shape_cast %8 : vector<2x1x4x6xf32> to vector<2x4x6xf32>
    %c0_20 = arith.constant 0 : index
    %c0_21 = arith.constant 0 : index
    %c1 = arith.constant 1 : index
    %c1_22 = arith.constant 1 : index
    %10 = vector.load %arg7[%c0_20, %c0_21, %c1, %c1_22] : memref<2x3x6x8xf32, #tpu.memory_space<vmem>>, vector<2x1x4x6xf32>
    %11 = vector.shape_cast %10 : vector<2x1x4x6xf32> to vector<2x4x6xf32>
    %12 = vector.shape_cast %9 : vector<2x4x6xf32> to vector<2x1x4x6xf32>
    tpu.vector_store %arg7[%c0_20, %c0_21, %c1, %c1_22], %12 {strides = array<i32>} : memref<2x3x6x8xf32, #tpu.memory_space<vmem>>, vector<2x1x4x6xf32>,
    %c0_23 = arith.constant 0 : index
    %c1_24 = arith.constant 1 : index
    %c0_25 = arith.constant 0 : index
    %c0_26 = arith.constant 0 : index
    %13 = vector.load %arg0[%c0_23, %c1_24, %c0_25, %c0_26] : memref<2x3x4x6xf32, #tpu.memory_space<vmem>>, vector<2x1x4x6xf32>
    %14 = vector.shape_cast %13 : vector<2x1x4x6xf32> to vector<2x4x6xf32>
    %c0_27 = arith.constant 0 : index
    %c1_28 = arith.constant 1 : index
    %c1_29 = arith.constant 1 : index
    %c1_30 = arith.constant 1 : index
    %15 = vector.load %arg7[%c0_27, %c1_28, %c1_29, %c1_30] : memref<2x3x6x8xf32, #tpu.memory_space<vmem>>, vector<2x1x4x6xf32>
    %16 = vector.shape_cast %15 : vector<2x1x4x6xf32> to vector<2x4x6xf32>
    %17 = vector.shape_cast %14 : vector<2x4x6xf32> to vector<2x1x4x6xf32>
    tpu.vector_store %arg7[%c0_27, %c1_28, %c1_29, %c1_30], %17 {strides = array<i32>} : memref<2x3x6x8xf32, #tpu.memory_space<vmem>>, vector<2x1x4x6xf32>,
    %c0_31 = arith.constant 0 : index
    %c2 = arith.constant 2 : index
    %c0_32 = arith.constant 0 : index
    %c0_33 = arith.constant 0 : index
    %18 = vector.load %arg0[%c0_31, %c2, %c0_32, %c0_33] : memref<2x3x4x6xf32, #tpu.memory_space<vmem>>, vector<2x1x4x6xf32>
    %19 = vector.shape_cast %18 : vector<2x1x4x6xf32> to vector<2x4x6xf32>
    %c0_34 = arith.constant 0 : index
    %c2_35 = arith.constant 2 : index
    %c1_36 = arith.constant 1 : index
    %c1_37 = arith.constant 1 : index
    %20 = vector.load %arg7[%c0_34, %c2_35, %c1_36, %c1_37] : memref<2x3x6x8xf32, #tpu.memory_space<vmem>>, vector<2x1x4x6xf32>
    %21 = vector.shape_cast %20 : vector<2x1x4x6xf32> to vector<2x4x6xf32>
    %22 = vector.shape_cast %19 : vector<2x4x6xf32> to vector<2x1x4x6xf32>
    tpu.vector_store %arg7[%c0_34, %c2_35, %c1_36, %c1_37], %22 {strides = array<i32>} : memref<2x3x6x8xf32, #tpu.memory_space<vmem>>, vector<2x1x4x6xf32>,
    %c0_38 = arith.constant 0 : index
    %23 = memref.load %arg2[%c0_38] : memref<3xf32, #tpu.memory_space<smem>>
    %24 = vector.broadcast %23 : f32 to vector<2x4x6xf32>
    %c1_39 = arith.constant 1 : index
    %25 = memref.load %arg2[%c1_39] : memref<3xf32, #tpu.memory_space<smem>>
    %26 = vector.broadcast %25 : f32 to vector<2x4x6xf32>
    %c2_40 = arith.constant 2 : index
    %27 = memref.load %arg2[%c2_40] : memref<3xf32, #tpu.memory_space<smem>>
    %28 = vector.broadcast %27 : f32 to vector<2x4x6xf32>
    %c0_41 = arith.constant 0 : index
    %c0_42 = arith.constant 0 : index
    %c0_43 = arith.constant 0 : index
    %c0_44 = arith.constant 0 : index
    %29 = vector.load %arg7[%c0_41, %c0_42, %c0_43, %c0_44] : memref<2x3x6x8xf32, #tpu.memory_space<vmem>>, vector<2x1x4x6xf32>
    %30 = vector.shape_cast %29 : vector<2x1x4x6xf32> to vector<2x4x6xf32>
    %c0_45 = arith.constant 0 : index
    %31 = memref.load %arg1[%c0_45] : memref<81xf32, #tpu.memory_space<smem>>
    %32 = vector.broadcast %31 : f32 to vector<2x4x6xf32>
    %33 = arith.mulf %32, %30 : vector<2x4x6xf32>
    %34 = arith.addf %24, %33 : vector<2x4x6xf32>
    %c27 = arith.constant 27 : index
    %35 = memref.load %arg1[%c27] : memref<81xf32, #tpu.memory_space<smem>>
    %36 = vector.broadcast %35 : f32 to vector<2x4x6xf32>
    %37 = arith.mulf %36, %30 : vector<2x4x6xf32>
    %38 = arith.addf %26, %37 : vector<2x4x6xf32>
    %c54 = arith.constant 54 : index
    %39 = memref.load %arg1[%c54] : memref<81xf32, #tpu.memory_space<smem>>
    %40 = vector.broadcast %39 : f32 to vector<2x4x6xf32>
    %41 = arith.mulf %40, %30 : vector<2x4x6xf32>
    %42 = arith.addf %28, %41 : vector<2x4x6xf32>
    %c0_46 = arith.constant 0 : index
    %c0_47 = arith.constant 0 : index
    %c0_48 = arith.constant 0 : index
    %c1_49 = arith.constant 1 : index
    %43 = vector.load %arg7[%c0_46, %c0_47, %c0_48, %c1_49] : memref<2x3x6x8xf32, #tpu.memory_space<vmem>>, vector<2x1x4x6xf32>
    %44 = vector.shape_cast %43 : vector<2x1x4x6xf32> to vector<2x4x6xf32>
    %c1_50 = arith.constant 1 : index
    %45 = memref.load %arg1[%c1_50] : memref<81xf32, #tpu.memory_space<smem>>
    %46 = vector.broadcast %45 : f32 to vector<2x4x6xf32>
    %47 = arith.mulf %46, %44 : vector<2x4x6xf32>
    %48 = arith.addf %34, %47 : vector<2x4x6xf32>
    %c28 = arith.constant 28 : index
    %49 = memref.load %arg1[%c28] : memref<81xf32, #tpu.memory_space<smem>>
    %50 = vector.broadcast %49 : f32 to vector<2x4x6xf32>
    %51 = arith.mulf %50, %44 : vector<2x4x6xf32>
    %52 = arith.addf %38, %51 : vector<2x4x6xf32>
    %c55 = arith.constant 55 : index
    %53 = memref.load %arg1[%c55] : memref<81xf32, #tpu.memory_space<smem>>
    %54 = vector.broadcast %53 : f32 to vector<2x4x6xf32>
    %55 = arith.mulf %54, %44 : vector<2x4x6xf32>
    %56 = arith.addf %42, %55 : vector<2x4x6xf32>
    %c0_51 = arith.constant 0 : index
    %c0_52 = arith.constant 0 : index
    %c0_53 = arith.constant 0 : index
    %c2_54 = arith.constant 2 : index
    %57 = vector.load %arg7[%c0_51, %c0_52, %c0_53, %c2_54] : memref<2x3x6x8xf32, #tpu.memory_space<vmem>>, vector<2x1x4x6xf32>
    %58 = vector.shape_cast %57 : vector<2x1x4x6xf32> to vector<2x4x6xf32>
    %c2_55 = arith.constant 2 : index
    %59 = memref.load %arg1[%c2_55] : memref<81xf32, #tpu.memory_space<smem>>
    %60 = vector.broadcast %59 : f32 to vector<2x4x6xf32>
    %61 = arith.mulf %60, %58 : vector<2x4x6xf32>
    %62 = arith.addf %48, %61 : vector<2x4x6xf32>
    %c29 = arith.constant 29 : index
    %63 = memref.load %arg1[%c29] : memref<81xf32, #tpu.memory_space<smem>>
    %64 = vector.broadcast %63 : f32 to vector<2x4x6xf32>
    %65 = arith.mulf %64, %58 : vector<2x4x6xf32>
    %66 = arith.addf %52, %65 : vector<2x4x6xf32>
    %c56 = arith.constant 56 : index
    %67 = memref.load %arg1[%c56] : memref<81xf32, #tpu.memory_space<smem>>
    %68 = vector.broadcast %67 : f32 to vector<2x4x6xf32>
    %69 = arith.mulf %68, %58 : vector<2x4x6xf32>
    %70 = arith.addf %56, %69 : vector<2x4x6xf32>
    %c0_56 = arith.constant 0 : index
    %c0_57 = arith.constant 0 : index
    %c1_58 = arith.constant 1 : index
    %c0_59 = arith.constant 0 : index
    %71 = vector.load %arg7[%c0_56, %c0_57, %c1_58, %c0_59] : memref<2x3x6x8xf32, #tpu.memory_space<vmem>>, vector<2x1x4x6xf32>
    %72 = vector.shape_cast %71 : vector<2x1x4x6xf32> to vector<2x4x6xf32>
    %c3 = arith.constant 3 : index
    %73 = memref.load %arg1[%c3] : memref<81xf32, #tpu.memory_space<smem>>
    %74 = vector.broadcast %73 : f32 to vector<2x4x6xf32>
    %75 = arith.mulf %74, %72 : vector<2x4x6xf32>
    %76 = arith.addf %62, %75 : vector<2x4x6xf32>
    %c30 = arith.constant 30 : index
    %77 = memref.load %arg1[%c30] : memref<81xf32, #tpu.memory_space<smem>>
    %78 = vector.broadcast %77 : f32 to vector<2x4x6xf32>
    %79 = arith.mulf %78, %72 : vector<2x4x6xf32>
    %80 = arith.addf %66, %79 : vector<2x4x6xf32>
    %c57 = arith.constant 57 : index
    %81 = memref.load %arg1[%c57] : memref<81xf32, #tpu.memory_space<smem>>
    %82 = vector.broadcast %81 : f32 to vector<2x4x6xf32>
    %83 = arith.mulf %82, %72 : vector<2x4x6xf32>
    %84 = arith.addf %70, %83 : vector<2x4x6xf32>
    %c0_60 = arith.constant 0 : index
    %c0_61 = arith.constant 0 : index
    %c1_62 = arith.constant 1 : index
    %c1_63 = arith.constant 1 : index
    %85 = vector.load %arg7[%c0_60, %c0_61, %c1_62, %c1_63] : memref<2x3x6x8xf32, #tpu.memory_space<vmem>>, vector<2x1x4x6xf32>
    %86 = vector.shape_cast %85 : vector<2x1x4x6xf32> to vector<2x4x6xf32>
    %c4 = arith.constant 4 : index
    %87 = memref.load %arg1[%c4] : memref<81xf32, #tpu.memory_space<smem>>
    %88 = vector.broadcast %87 : f32 to vector<2x4x6xf32>
    %89 = arith.mulf %88, %86 : vector<2x4x6xf32>
    %90 = arith.addf %76, %89 : vector<2x4x6xf32>
    %c31 = arith.constant 31 : index
    %91 = memref.load %arg1[%c31] : memref<81xf32, #tpu.memory_space<smem>>
    %92 = vector.broadcast %91 : f32 to vector<2x4x6xf32>
    %93 = arith.mulf %92, %86 : vector<2x4x6xf32>
    %94 = arith.addf %80, %93 : vector<2x4x6xf32>
    %c58 = arith.constant 58 : index
    %95 = memref.load %arg1[%c58] : memref<81xf32, #tpu.memory_space<smem>>
    %96 = vector.broadcast %95 : f32 to vector<2x4x6xf32>
    %97 = arith.mulf %96, %86 : vector<2x4x6xf32>
    %98 = arith.addf %84, %97 : vector<2x4x6xf32>
    %c0_64 = arith.constant 0 : index
    %c0_65 = arith.constant 0 : index
    %c1_66 = arith.constant 1 : index
    %c2_67 = arith.constant 2 : index
    %99 = vector.load %arg7[%c0_64, %c0_65, %c1_66, %c2_67] : memref<2x3x6x8xf32, #tpu.memory_space<vmem>>, vector<2x1x4x6xf32>
    %100 = vector.shape_cast %99 : vector<2x1x4x6xf32> to vector<2x4x6xf32>
    %c5_68 = arith.constant 5 : index
    %101 = memref.load %arg1[%c5_68] : memref<81xf32, #tpu.memory_space<smem>>
    %102 = vector.broadcast %101 : f32 to vector<2x4x6xf32>
    %103 = arith.mulf %102, %100 : vector<2x4x6xf32>
    %104 = arith.addf %90, %103 : vector<2x4x6xf32>
    %c32 = arith.constant 32 : index
    %105 = memref.load %arg1[%c32] : memref<81xf32, #tpu.memory_space<smem>>
    %106 = vector.broadcast %105 : f32 to vector<2x4x6xf32>
    %107 = arith.mulf %106, %100 : vector<2x4x6xf32>
    %108 = arith.addf %94, %107 : vector<2x4x6xf32>
    %c59 = arith.constant 59 : index
    %109 = memref.load %arg1[%c59] : memref<81xf32, #tpu.memory_space<smem>>
    %110 = vector.broadcast %109 : f32 to vector<2x4x6xf32>
    %111 = arith.mulf %110, %100 : vector<2x4x6xf32>
    %112 = arith.addf %98, %111 : vector<2x4x6xf32>
    %c0_69 = arith.constant 0 : index
    %c0_70 = arith.constant 0 : index
    %c2_71 = arith.constant 2 : index
    %c0_72 = arith.constant 0 : index
    %113 = vector.load %arg7[%c0_69, %c0_70, %c2_71, %c0_72] : memref<2x3x6x8xf32, #tpu.memory_space<vmem>>, vector<2x1x4x6xf32>
    %114 = vector.shape_cast %113 : vector<2x1x4x6xf32> to vector<2x4x6xf32>
    %c6 = arith.constant 6 : index
    %115 = memref.load %arg1[%c6] : memref<81xf32, #tpu.memory_space<smem>>
    %116 = vector.broadcast %115 : f32 to vector<2x4x6xf32>
    %117 = arith.mulf %116, %114 : vector<2x4x6xf32>
    %118 = arith.addf %104, %117 : vector<2x4x6xf32>
    %c33 = arith.constant 33 : index
    %119 = memref.load %arg1[%c33] : memref<81xf32, #tpu.memory_space<smem>>
    %120 = vector.broadcast %119 : f32 to vector<2x4x6xf32>
    %121 = arith.mulf %120, %114 : vector<2x4x6xf32>
    %122 = arith.addf %108, %121 : vector<2x4x6xf32>
    %c60 = arith.constant 60 : index
    %123 = memref.load %arg1[%c60] : memref<81xf32, #tpu.memory_space<smem>>
    %124 = vector.broadcast %123 : f32 to vector<2x4x6xf32>
    %125 = arith.mulf %124, %114 : vector<2x4x6xf32>
    %126 = arith.addf %112, %125 : vector<2x4x6xf32>
    %c0_73 = arith.constant 0 : index
    %c0_74 = arith.constant 0 : index
    %c2_75 = arith.constant 2 : index
    %c1_76 = arith.constant 1 : index
    %127 = vector.load %arg7[%c0_73, %c0_74, %c2_75, %c1_76] : memref<2x3x6x8xf32, #tpu.memory_space<vmem>>, vector<2x1x4x6xf32>
    %128 = vector.shape_cast %127 : vector<2x1x4x6xf32> to vector<2x4x6xf32>
    %c7_77 = arith.constant 7 : index
    %129 = memref.load %arg1[%c7_77] : memref<81xf32, #tpu.memory_space<smem>>
    %130 = vector.broadcast %129 : f32 to vector<2x4x6xf32>
    %131 = arith.mulf %130, %128 : vector<2x4x6xf32>
    %132 = arith.addf %118, %131 : vector<2x4x6xf32>
    %c34 = arith.constant 34 : index
    %133 = memref.load %arg1[%c34] : memref<81xf32, #tpu.memory_space<smem>>
    %134 = vector.broadcast %133 : f32 to vector<2x4x6xf32>
    %135 = arith.mulf %134, %128 : vector<2x4x6xf32>
    %136 = arith.addf %122, %135 : vector<2x4x6xf32>
    %c61 = arith.constant 61 : index
    %137 = memref.load %arg1[%c61] : memref<81xf32, #tpu.memory_space<smem>>
    %138 = vector.broadcast %137 : f32 to vector<2x4x6xf32>
    %139 = arith.mulf %138, %128 : vector<2x4x6xf32>
    %140 = arith.addf %126, %139 : vector<2x4x6xf32>
    %c0_78 = arith.constant 0 : index
    %c0_79 = arith.constant 0 : index
    %c2_80 = arith.constant 2 : index
    %c2_81 = arith.constant 2 : index
    %141 = vector.load %arg7[%c0_78, %c0_79, %c2_80, %c2_81] : memref<2x3x6x8xf32, #tpu.memory_space<vmem>>, vector<2x1x4x6xf32>
    %142 = vector.shape_cast %141 : vector<2x1x4x6xf32> to vector<2x4x6xf32>
    %c8 = arith.constant 8 : index
    %143 = memref.load %arg1[%c8] : memref<81xf32, #tpu.memory_space<smem>>
    %144 = vector.broadcast %143 : f32 to vector<2x4x6xf32>
    %145 = arith.mulf %144, %142 : vector<2x4x6xf32>
    %146 = arith.addf %132, %145 : vector<2x4x6xf32>
    %c35 = arith.constant 35 : index
    %147 = memref.load %arg1[%c35] : memref<81xf32, #tpu.memory_space<smem>>
    %148 = vector.broadcast %147 : f32 to vector<2x4x6xf32>
    %149 = arith.mulf %148, %142 : vector<2x4x6xf32>
    %150 = arith.addf %136, %149 : vector<2x4x6xf32>
    %c62 = arith.constant 62 : index
    %151 = memref.load %arg1[%c62] : memref<81xf32, #tpu.memory_space<smem>>
    %152 = vector.broadcast %151 : f32 to vector<2x4x6xf32>
    %153 = arith.mulf %152, %142 : vector<2x4x6xf32>
    %154 = arith.addf %140, %153 : vector<2x4x6xf32>
    %c0_82 = arith.constant 0 : index
    %c1_83 = arith.constant 1 : index
    %c0_84 = arith.constant 0 : index
    %c0_85 = arith.constant 0 : index
    %155 = vector.load %arg7[%c0_82, %c1_83, %c0_84, %c0_85] : memref<2x3x6x8xf32, #tpu.memory_space<vmem>>, vector<2x1x4x6xf32>
    %156 = vector.shape_cast %155 : vector<2x1x4x6xf32> to vector<2x4x6xf32>
    %c9 = arith.constant 9 : index
    %157 = memref.load %arg1[%c9] : memref<81xf32, #tpu.memory_space<smem>>
    %158 = vector.broadcast %157 : f32 to vector<2x4x6xf32>
    %159 = arith.mulf %158, %156 : vector<2x4x6xf32>
    %160 = arith.addf %146, %159 : vector<2x4x6xf32>
    %c36 = arith.constant 36 : index
    %161 = memref.load %arg1[%c36] : memref<81xf32, #tpu.memory_space<smem>>
    %162 = vector.broadcast %161 : f32 to vector<2x4x6xf32>
    %163 = arith.mulf %162, %156 : vector<2x4x6xf32>
    %164 = arith.addf %150, %163 : vector<2x4x6xf32>
    %c63 = arith.constant 63 : index
    %165 = memref.load %arg1[%c63] : memref<81xf32, #tpu.memory_space<smem>>
    %166 = vector.broadcast %165 : f32 to vector<2x4x6xf32>
    %167 = arith.mulf %166, %156 : vector<2x4x6xf32>
    %168 = arith.addf %154, %167 : vector<2x4x6xf32>
    %c0_86 = arith.constant 0 : index
    %c1_87 = arith.constant 1 : index
    %c0_88 = arith.constant 0 : index
    %c1_89 = arith.constant 1 : index
    %169 = vector.load %arg7[%c0_86, %c1_87, %c0_88, %c1_89] : memref<2x3x6x8xf32, #tpu.memory_space<vmem>>, vector<2x1x4x6xf32>
    %170 = vector.shape_cast %169 : vector<2x1x4x6xf32> to vector<2x4x6xf32>
    %c10 = arith.constant 10 : index
    %171 = memref.load %arg1[%c10] : memref<81xf32, #tpu.memory_space<smem>>
    %172 = vector.broadcast %171 : f32 to vector<2x4x6xf32>
    %173 = arith.mulf %172, %170 : vector<2x4x6xf32>
    %174 = arith.addf %160, %173 : vector<2x4x6xf32>
    %c37 = arith.constant 37 : index
    %175 = memref.load %arg1[%c37] : memref<81xf32, #tpu.memory_space<smem>>
    %176 = vector.broadcast %175 : f32 to vector<2x4x6xf32>
    %177 = arith.mulf %176, %170 : vector<2x4x6xf32>
    %178 = arith.addf %164, %177 : vector<2x4x6xf32>
    %c64 = arith.constant 64 : index
    %179 = memref.load %arg1[%c64] : memref<81xf32, #tpu.memory_space<smem>>
    %180 = vector.broadcast %179 : f32 to vector<2x4x6xf32>
    %181 = arith.mulf %180, %170 : vector<2x4x6xf32>
    %182 = arith.addf %168, %181 : vector<2x4x6xf32>
    %c0_90 = arith.constant 0 : index
    %c1_91 = arith.constant 1 : index
    %c0_92 = arith.constant 0 : index
    %c2_93 = arith.constant 2 : index
    %183 = vector.load %arg7[%c0_90, %c1_91, %c0_92, %c2_93] : memref<2x3x6x8xf32, #tpu.memory_space<vmem>>, vector<2x1x4x6xf32>
    %184 = vector.shape_cast %183 : vector<2x1x4x6xf32> to vector<2x4x6xf32>
    %c11 = arith.constant 11 : index
    %185 = memref.load %arg1[%c11] : memref<81xf32, #tpu.memory_space<smem>>
    %186 = vector.broadcast %185 : f32 to vector<2x4x6xf32>
    %187 = arith.mulf %186, %184 : vector<2x4x6xf32>
    %188 = arith.addf %174, %187 : vector<2x4x6xf32>
    %c38 = arith.constant 38 : index
    %189 = memref.load %arg1[%c38] : memref<81xf32, #tpu.memory_space<smem>>
    %190 = vector.broadcast %189 : f32 to vector<2x4x6xf32>
    %191 = arith.mulf %190, %184 : vector<2x4x6xf32>
    %192 = arith.addf %178, %191 : vector<2x4x6xf32>
    %c65 = arith.constant 65 : index
    %193 = memref.load %arg1[%c65] : memref<81xf32, #tpu.memory_space<smem>>
    %194 = vector.broadcast %193 : f32 to vector<2x4x6xf32>
    %195 = arith.mulf %194, %184 : vector<2x4x6xf32>
    %196 = arith.addf %182, %195 : vector<2x4x6xf32>
    %c0_94 = arith.constant 0 : index
    %c1_95 = arith.constant 1 : index
    %c1_96 = arith.constant 1 : index
    %c0_97 = arith.constant 0 : index
    %197 = vector.load %arg7[%c0_94, %c1_95, %c1_96, %c0_97] : memref<2x3x6x8xf32, #tpu.memory_space<vmem>>, vector<2x1x4x6xf32>
    %198 = vector.shape_cast %197 : vector<2x1x4x6xf32> to vector<2x4x6xf32>
    %c12 = arith.constant 12 : index
    %199 = memref.load %arg1[%c12] : memref<81xf32, #tpu.memory_space<smem>>
    %200 = vector.broadcast %199 : f32 to vector<2x4x6xf32>
    %201 = arith.mulf %200, %198 : vector<2x4x6xf32>
    %202 = arith.addf %188, %201 : vector<2x4x6xf32>
    %c39 = arith.constant 39 : index
    %203 = memref.load %arg1[%c39] : memref<81xf32, #tpu.memory_space<smem>>
    %204 = vector.broadcast %203 : f32 to vector<2x4x6xf32>
    %205 = arith.mulf %204, %198 : vector<2x4x6xf32>
    %206 = arith.addf %192, %205 : vector<2x4x6xf32>
    %c66 = arith.constant 66 : index
    %207 = memref.load %arg1[%c66] : memref<81xf32, #tpu.memory_space<smem>>
    %208 = vector.broadcast %207 : f32 to vector<2x4x6xf32>
    %209 = arith.mulf %208, %198 : vector<2x4x6xf32>
    %210 = arith.addf %196, %209 : vector<2x4x6xf32>
    %c0_98 = arith.constant 0 : index
    %c1_99 = arith.constant 1 : index
    %c1_100 = arith.constant 1 : index
    %c1_101 = arith.constant 1 : index
    %211 = vector.load %arg7[%c0_98, %c1_99, %c1_100, %c1_101] : memref<2x3x6x8xf32, #tpu.memory_space<vmem>>, vector<2x1x4x6xf32>
    %212 = vector.shape_cast %211 : vector<2x1x4x6xf32> to vector<2x4x6xf32>
    %c13 = arith.constant 13 : index
    %213 = memref.load %arg1[%c13] : memref<81xf32, #tpu.memory_space<smem>>
    %214 = vector.broadcast %213 : f32 to vector<2x4x6xf32>
    %215 = arith.mulf %214, %212 : vector<2x4x6xf32>
    %216 = arith.addf %202, %215 : vector<2x4x6xf32>
    %c40 = arith.constant 40 : index
    %217 = memref.load %arg1[%c40] : memref<81xf32, #tpu.memory_space<smem>>
    %218 = vector.broadcast %217 : f32 to vector<2x4x6xf32>
    %219 = arith.mulf %218, %212 : vector<2x4x6xf32>
    %220 = arith.addf %206, %219 : vector<2x4x6xf32>
    %c67 = arith.constant 67 : index
    %221 = memref.load %arg1[%c67] : memref<81xf32, #tpu.memory_space<smem>>
    %222 = vector.broadcast %221 : f32 to vector<2x4x6xf32>
    %223 = arith.mulf %222, %212 : vector<2x4x6xf32>
    %224 = arith.addf %210, %223 : vector<2x4x6xf32>
    %c0_102 = arith.constant 0 : index
    %c1_103 = arith.constant 1 : index
    %c1_104 = arith.constant 1 : index
    %c2_105 = arith.constant 2 : index
    %225 = vector.load %arg7[%c0_102, %c1_103, %c1_104, %c2_105] : memref<2x3x6x8xf32, #tpu.memory_space<vmem>>, vector<2x1x4x6xf32>
    %226 = vector.shape_cast %225 : vector<2x1x4x6xf32> to vector<2x4x6xf32>
    %c14 = arith.constant 14 : index
    %227 = memref.load %arg1[%c14] : memref<81xf32, #tpu.memory_space<smem>>
    %228 = vector.broadcast %227 : f32 to vector<2x4x6xf32>
    %229 = arith.mulf %228, %226 : vector<2x4x6xf32>
    %230 = arith.addf %216, %229 : vector<2x4x6xf32>
    %c41 = arith.constant 41 : index
    %231 = memref.load %arg1[%c41] : memref<81xf32, #tpu.memory_space<smem>>
    %232 = vector.broadcast %231 : f32 to vector<2x4x6xf32>
    %233 = arith.mulf %232, %226 : vector<2x4x6xf32>
    %234 = arith.addf %220, %233 : vector<2x4x6xf32>
    %c68 = arith.constant 68 : index
    %235 = memref.load %arg1[%c68] : memref<81xf32, #tpu.memory_space<smem>>
    %236 = vector.broadcast %235 : f32 to vector<2x4x6xf32>
    %237 = arith.mulf %236, %226 : vector<2x4x6xf32>
    %238 = arith.addf %224, %237 : vector<2x4x6xf32>
    %c0_106 = arith.constant 0 : index
    %c1_107 = arith.constant 1 : index
    %c2_108 = arith.constant 2 : index
    %c0_109 = arith.constant 0 : index
    %239 = vector.load %arg7[%c0_106, %c1_107, %c2_108, %c0_109] : memref<2x3x6x8xf32, #tpu.memory_space<vmem>>, vector<2x1x4x6xf32>
    %240 = vector.shape_cast %239 : vector<2x1x4x6xf32> to vector<2x4x6xf32>
    %c15 = arith.constant 15 : index
    %241 = memref.load %arg1[%c15] : memref<81xf32, #tpu.memory_space<smem>>
    %242 = vector.broadcast %241 : f32 to vector<2x4x6xf32>
    %243 = arith.mulf %242, %240 : vector<2x4x6xf32>
    %244 = arith.addf %230, %243 : vector<2x4x6xf32>
    %c42 = arith.constant 42 : index
    %245 = memref.load %arg1[%c42] : memref<81xf32, #tpu.memory_space<smem>>
    %246 = vector.broadcast %245 : f32 to vector<2x4x6xf32>
    %247 = arith.mulf %246, %240 : vector<2x4x6xf32>
    %248 = arith.addf %234, %247 : vector<2x4x6xf32>
    %c69 = arith.constant 69 : index
    %249 = memref.load %arg1[%c69] : memref<81xf32, #tpu.memory_space<smem>>
    %250 = vector.broadcast %249 : f32 to vector<2x4x6xf32>
    %251 = arith.mulf %250, %240 : vector<2x4x6xf32>
    %252 = arith.addf %238, %251 : vector<2x4x6xf32>
    %c0_110 = arith.constant 0 : index
    %c1_111 = arith.constant 1 : index
    %c2_112 = arith.constant 2 : index
    %c1_113 = arith.constant 1 : index
    %253 = vector.load %arg7[%c0_110, %c1_111, %c2_112, %c1_113] : memref<2x3x6x8xf32, #tpu.memory_space<vmem>>, vector<2x1x4x6xf32>
    %254 = vector.shape_cast %253 : vector<2x1x4x6xf32> to vector<2x4x6xf32>
    %c16 = arith.constant 16 : index
    %255 = memref.load %arg1[%c16] : memref<81xf32, #tpu.memory_space<smem>>
    %256 = vector.broadcast %255 : f32 to vector<2x4x6xf32>
    %257 = arith.mulf %256, %254 : vector<2x4x6xf32>
    %258 = arith.addf %244, %257 : vector<2x4x6xf32>
    %c43 = arith.constant 43 : index
    %259 = memref.load %arg1[%c43] : memref<81xf32, #tpu.memory_space<smem>>
    %260 = vector.broadcast %259 : f32 to vector<2x4x6xf32>
    %261 = arith.mulf %260, %254 : vector<2x4x6xf32>
    %262 = arith.addf %248, %261 : vector<2x4x6xf32>
    %c70 = arith.constant 70 : index
    %263 = memref.load %arg1[%c70] : memref<81xf32, #tpu.memory_space<smem>>
    %264 = vector.broadcast %263 : f32 to vector<2x4x6xf32>
    %265 = arith.mulf %264, %254 : vector<2x4x6xf32>
    %266 = arith.addf %252, %265 : vector<2x4x6xf32>
    %c0_114 = arith.constant 0 : index
    %c1_115 = arith.constant 1 : index
    %c2_116 = arith.constant 2 : index
    %c2_117 = arith.constant 2 : index
    %267 = vector.load %arg7[%c0_114, %c1_115, %c2_116, %c2_117] : memref<2x3x6x8xf32, #tpu.memory_space<vmem>>, vector<2x1x4x6xf32>
    %268 = vector.shape_cast %267 : vector<2x1x4x6xf32> to vector<2x4x6xf32>
    %c17 = arith.constant 17 : index
    %269 = memref.load %arg1[%c17] : memref<81xf32, #tpu.memory_space<smem>>
    %270 = vector.broadcast %269 : f32 to vector<2x4x6xf32>
    %271 = arith.mulf %270, %268 : vector<2x4x6xf32>
    %272 = arith.addf %258, %271 : vector<2x4x6xf32>
    %c44 = arith.constant 44 : index
    %273 = memref.load %arg1[%c44] : memref<81xf32, #tpu.memory_space<smem>>
    %274 = vector.broadcast %273 : f32 to vector<2x4x6xf32>
    %275 = arith.mulf %274, %268 : vector<2x4x6xf32>
    %276 = arith.addf %262, %275 : vector<2x4x6xf32>
    %c71 = arith.constant 71 : index
    %277 = memref.load %arg1[%c71] : memref<81xf32, #tpu.memory_space<smem>>
    %278 = vector.broadcast %277 : f32 to vector<2x4x6xf32>
    %279 = arith.mulf %278, %268 : vector<2x4x6xf32>
    %280 = arith.addf %266, %279 : vector<2x4x6xf32>
    %c0_118 = arith.constant 0 : index
    %c2_119 = arith.constant 2 : index
    %c0_120 = arith.constant 0 : index
    %c0_121 = arith.constant 0 : index
    %281 = vector.load %arg7[%c0_118, %c2_119, %c0_120, %c0_121] : memref<2x3x6x8xf32, #tpu.memory_space<vmem>>, vector<2x1x4x6xf32>
    %282 = vector.shape_cast %281 : vector<2x1x4x6xf32> to vector<2x4x6xf32>
    %c18 = arith.constant 18 : index
    %283 = memref.load %arg1[%c18] : memref<81xf32, #tpu.memory_space<smem>>
    %284 = vector.broadcast %283 : f32 to vector<2x4x6xf32>
    %285 = arith.mulf %284, %282 : vector<2x4x6xf32>
    %286 = arith.addf %272, %285 : vector<2x4x6xf32>
    %c45 = arith.constant 45 : index
    %287 = memref.load %arg1[%c45] : memref<81xf32, #tpu.memory_space<smem>>
    %288 = vector.broadcast %287 : f32 to vector<2x4x6xf32>
    %289 = arith.mulf %288, %282 : vector<2x4x6xf32>
    %290 = arith.addf %276, %289 : vector<2x4x6xf32>
    %c72 = arith.constant 72 : index
    %291 = memref.load %arg1[%c72] : memref<81xf32, #tpu.memory_space<smem>>
    %292 = vector.broadcast %291 : f32 to vector<2x4x6xf32>
    %293 = arith.mulf %292, %282 : vector<2x4x6xf32>
    %294 = arith.addf %280, %293 : vector<2x4x6xf32>
    %c0_122 = arith.constant 0 : index
    %c2_123 = arith.constant 2 : index
    %c0_124 = arith.constant 0 : index
    %c1_125 = arith.constant 1 : index
    %295 = vector.load %arg7[%c0_122, %c2_123, %c0_124, %c1_125] : memref<2x3x6x8xf32, #tpu.memory_space<vmem>>, vector<2x1x4x6xf32>
    %296 = vector.shape_cast %295 : vector<2x1x4x6xf32> to vector<2x4x6xf32>
    %c19 = arith.constant 19 : index
    %297 = memref.load %arg1[%c19] : memref<81xf32, #tpu.memory_space<smem>>
    %298 = vector.broadcast %297 : f32 to vector<2x4x6xf32>
    %299 = arith.mulf %298, %296 : vector<2x4x6xf32>
    %300 = arith.addf %286, %299 : vector<2x4x6xf32>
    %c46 = arith.constant 46 : index
    %301 = memref.load %arg1[%c46] : memref<81xf32, #tpu.memory_space<smem>>
    %302 = vector.broadcast %301 : f32 to vector<2x4x6xf32>
    %303 = arith.mulf %302, %296 : vector<2x4x6xf32>
    %304 = arith.addf %290, %303 : vector<2x4x6xf32>
    %c73 = arith.constant 73 : index
    %305 = memref.load %arg1[%c73] : memref<81xf32, #tpu.memory_space<smem>>
    %306 = vector.broadcast %305 : f32 to vector<2x4x6xf32>
    %307 = arith.mulf %306, %296 : vector<2x4x6xf32>
    %308 = arith.addf %294, %307 : vector<2x4x6xf32>
    %c0_126 = arith.constant 0 : index
    %c2_127 = arith.constant 2 : index
    %c0_128 = arith.constant 0 : index
    %c2_129 = arith.constant 2 : index
    %309 = vector.load %arg7[%c0_126, %c2_127, %c0_128, %c2_129] : memref<2x3x6x8xf32, #tpu.memory_space<vmem>>, vector<2x1x4x6xf32>
    %310 = vector.shape_cast %309 : vector<2x1x4x6xf32> to vector<2x4x6xf32>
    %c20 = arith.constant 20 : index
    %311 = memref.load %arg1[%c20] : memref<81xf32, #tpu.memory_space<smem>>
    %312 = vector.broadcast %311 : f32 to vector<2x4x6xf32>
    %313 = arith.mulf %312, %310 : vector<2x4x6xf32>
    %314 = arith.addf %300, %313 : vector<2x4x6xf32>
    %c47 = arith.constant 47 : index
    %315 = memref.load %arg1[%c47] : memref<81xf32, #tpu.memory_space<smem>>
    %316 = vector.broadcast %315 : f32 to vector<2x4x6xf32>
    %317 = arith.mulf %316, %310 : vector<2x4x6xf32>
    %318 = arith.addf %304, %317 : vector<2x4x6xf32>
    %c74 = arith.constant 74 : index
    %319 = memref.load %arg1[%c74] : memref<81xf32, #tpu.memory_space<smem>>
    %320 = vector.broadcast %319 : f32 to vector<2x4x6xf32>
    %321 = arith.mulf %320, %310 : vector<2x4x6xf32>
    %322 = arith.addf %308, %321 : vector<2x4x6xf32>
    %c0_130 = arith.constant 0 : index
    %c2_131 = arith.constant 2 : index
    %c1_132 = arith.constant 1 : index
    %c0_133 = arith.constant 0 : index
    %323 = vector.load %arg7[%c0_130, %c2_131, %c1_132, %c0_133] : memref<2x3x6x8xf32, #tpu.memory_space<vmem>>, vector<2x1x4x6xf32>
    %324 = vector.shape_cast %323 : vector<2x1x4x6xf32> to vector<2x4x6xf32>
    %c21 = arith.constant 21 : index
    %325 = memref.load %arg1[%c21] : memref<81xf32, #tpu.memory_space<smem>>
    %326 = vector.broadcast %325 : f32 to vector<2x4x6xf32>
    %327 = arith.mulf %326, %324 : vector<2x4x6xf32>
    %328 = arith.addf %314, %327 : vector<2x4x6xf32>
    %c48 = arith.constant 48 : index
    %329 = memref.load %arg1[%c48] : memref<81xf32, #tpu.memory_space<smem>>
    %330 = vector.broadcast %329 : f32 to vector<2x4x6xf32>
    %331 = arith.mulf %330, %324 : vector<2x4x6xf32>
    %332 = arith.addf %318, %331 : vector<2x4x6xf32>
    %c75 = arith.constant 75 : index
    %333 = memref.load %arg1[%c75] : memref<81xf32, #tpu.memory_space<smem>>
    %334 = vector.broadcast %333 : f32 to vector<2x4x6xf32>
    %335 = arith.mulf %334, %324 : vector<2x4x6xf32>
    %336 = arith.addf %322, %335 : vector<2x4x6xf32>
    %c0_134 = arith.constant 0 : index
    %c2_135 = arith.constant 2 : index
    %c1_136 = arith.constant 1 : index
    %c1_137 = arith.constant 1 : index
    %337 = vector.load %arg7[%c0_134, %c2_135, %c1_136, %c1_137] : memref<2x3x6x8xf32, #tpu.memory_space<vmem>>, vector<2x1x4x6xf32>
    %338 = vector.shape_cast %337 : vector<2x1x4x6xf32> to vector<2x4x6xf32>
    %c22 = arith.constant 22 : index
    %339 = memref.load %arg1[%c22] : memref<81xf32, #tpu.memory_space<smem>>
    %340 = vector.broadcast %339 : f32 to vector<2x4x6xf32>
    %341 = arith.mulf %340, %338 : vector<2x4x6xf32>
    %342 = arith.addf %328, %341 : vector<2x4x6xf32>
    %c49 = arith.constant 49 : index
    %343 = memref.load %arg1[%c49] : memref<81xf32, #tpu.memory_space<smem>>
    %344 = vector.broadcast %343 : f32 to vector<2x4x6xf32>
    %345 = arith.mulf %344, %338 : vector<2x4x6xf32>
    %346 = arith.addf %332, %345 : vector<2x4x6xf32>
    %c76 = arith.constant 76 : index
    %347 = memref.load %arg1[%c76] : memref<81xf32, #tpu.memory_space<smem>>
    %348 = vector.broadcast %347 : f32 to vector<2x4x6xf32>
    %349 = arith.mulf %348, %338 : vector<2x4x6xf32>
    %350 = arith.addf %336, %349 : vector<2x4x6xf32>
    %c0_138 = arith.constant 0 : index
    %c2_139 = arith.constant 2 : index
    %c1_140 = arith.constant 1 : index
    %c2_141 = arith.constant 2 : index
    %351 = vector.load %arg7[%c0_138, %c2_139, %c1_140, %c2_141] : memref<2x3x6x8xf32, #tpu.memory_space<vmem>>, vector<2x1x4x6xf32>
    %352 = vector.shape_cast %351 : vector<2x1x4x6xf32> to vector<2x4x6xf32>
    %c23 = arith.constant 23 : index
    %353 = memref.load %arg1[%c23] : memref<81xf32, #tpu.memory_space<smem>>
    %354 = vector.broadcast %353 : f32 to vector<2x4x6xf32>
    %355 = arith.mulf %354, %352 : vector<2x4x6xf32>
    %356 = arith.addf %342, %355 : vector<2x4x6xf32>
    %c50 = arith.constant 50 : index
    %357 = memref.load %arg1[%c50] : memref<81xf32, #tpu.memory_space<smem>>
    %358 = vector.broadcast %357 : f32 to vector<2x4x6xf32>
    %359 = arith.mulf %358, %352 : vector<2x4x6xf32>
    %360 = arith.addf %346, %359 : vector<2x4x6xf32>
    %c77 = arith.constant 77 : index
    %361 = memref.load %arg1[%c77] : memref<81xf32, #tpu.memory_space<smem>>
    %362 = vector.broadcast %361 : f32 to vector<2x4x6xf32>
    %363 = arith.mulf %362, %352 : vector<2x4x6xf32>
    %364 = arith.addf %350, %363 : vector<2x4x6xf32>
    %c0_142 = arith.constant 0 : index
    %c2_143 = arith.constant 2 : index
    %c2_144 = arith.constant 2 : index
    %c0_145 = arith.constant 0 : index
    %365 = vector.load %arg7[%c0_142, %c2_143, %c2_144, %c0_145] : memref<2x3x6x8xf32, #tpu.memory_space<vmem>>, vector<2x1x4x6xf32>
    %366 = vector.shape_cast %365 : vector<2x1x4x6xf32> to vector<2x4x6xf32>
    %c24 = arith.constant 24 : index
    %367 = memref.load %arg1[%c24] : memref<81xf32, #tpu.memory_space<smem>>
    %368 = vector.broadcast %367 : f32 to vector<2x4x6xf32>
    %369 = arith.mulf %368, %366 : vector<2x4x6xf32>
    %370 = arith.addf %356, %369 : vector<2x4x6xf32>
    %c51 = arith.constant 51 : index
    %371 = memref.load %arg1[%c51] : memref<81xf32, #tpu.memory_space<smem>>
    %372 = vector.broadcast %371 : f32 to vector<2x4x6xf32>
    %373 = arith.mulf %372, %366 : vector<2x4x6xf32>
    %374 = arith.addf %360, %373 : vector<2x4x6xf32>
    %c78 = arith.constant 78 : index
    %375 = memref.load %arg1[%c78] : memref<81xf32, #tpu.memory_space<smem>>
    %376 = vector.broadcast %375 : f32 to vector<2x4x6xf32>
    %377 = arith.mulf %376, %366 : vector<2x4x6xf32>
    %378 = arith.addf %364, %377 : vector<2x4x6xf32>
    %c0_146 = arith.constant 0 : index
    %c2_147 = arith.constant 2 : index
    %c2_148 = arith.constant 2 : index
    %c1_149 = arith.constant 1 : index
    %379 = vector.load %arg7[%c0_146, %c2_147, %c2_148, %c1_149] : memref<2x3x6x8xf32, #tpu.memory_space<vmem>>, vector<2x1x4x6xf32>
    %380 = vector.shape_cast %379 : vector<2x1x4x6xf32> to vector<2x4x6xf32>
    %c25 = arith.constant 25 : index
    %381 = memref.load %arg1[%c25] : memref<81xf32, #tpu.memory_space<smem>>
    %382 = vector.broadcast %381 : f32 to vector<2x4x6xf32>
    %383 = arith.mulf %382, %380 : vector<2x4x6xf32>
    %384 = arith.addf %370, %383 : vector<2x4x6xf32>
    %c52 = arith.constant 52 : index
    %385 = memref.load %arg1[%c52] : memref<81xf32, #tpu.memory_space<smem>>
    %386 = vector.broadcast %385 : f32 to vector<2x4x6xf32>
    %387 = arith.mulf %386, %380 : vector<2x4x6xf32>
    %388 = arith.addf %374, %387 : vector<2x4x6xf32>
    %c79 = arith.constant 79 : index
    %389 = memref.load %arg1[%c79] : memref<81xf32, #tpu.memory_space<smem>>
    %390 = vector.broadcast %389 : f32 to vector<2x4x6xf32>
    %391 = arith.mulf %390, %380 : vector<2x4x6xf32>
    %392 = arith.addf %378, %391 : vector<2x4x6xf32>
    %c0_150 = arith.constant 0 : index
    %c2_151 = arith.constant 2 : index
    %c2_152 = arith.constant 2 : index
    %c2_153 = arith.constant 2 : index
    %393 = vector.load %arg7[%c0_150, %c2_151, %c2_152, %c2_153] : memref<2x3x6x8xf32, #tpu.memory_space<vmem>>, vector<2x1x4x6xf32>
    %394 = vector.shape_cast %393 : vector<2x1x4x6xf32> to vector<2x4x6xf32>
    %c26 = arith.constant 26 : index
    %395 = memref.load %arg1[%c26] : memref<81xf32, #tpu.memory_space<smem>>
    %396 = vector.broadcast %395 : f32 to vector<2x4x6xf32>
    %397 = arith.mulf %396, %394 : vector<2x4x6xf32>
    %398 = arith.addf %384, %397 : vector<2x4x6xf32>
    %c53 = arith.constant 53 : index
    %399 = memref.load %arg1[%c53] : memref<81xf32, #tpu.memory_space<smem>>
    %400 = vector.broadcast %399 : f32 to vector<2x4x6xf32>
    %401 = arith.mulf %400, %394 : vector<2x4x6xf32>
    %402 = arith.addf %388, %401 : vector<2x4x6xf32>
    %c80 = arith.constant 80 : index
    %403 = memref.load %arg1[%c80] : memref<81xf32, #tpu.memory_space<smem>>
    %404 = vector.broadcast %403 : f32 to vector<2x4x6xf32>
    %405 = arith.mulf %404, %394 : vector<2x4x6xf32>
    %406 = arith.addf %392, %405 : vector<2x4x6xf32>
    %c0_154 = arith.constant 0 : index
    %c0_155 = arith.constant 0 : index
    %c0_156 = arith.constant 0 : index
    %c0_157 = arith.constant 0 : index
    %407 = vector.load %arg6[%c0_154, %c0_155, %c0_156, %c0_157] : memref<2x3x4x6xf32, #tpu.memory_space<vmem>>, vector<2x1x4x6xf32>
    %408 = vector.shape_cast %407 : vector<2x1x4x6xf32> to vector<2x4x6xf32>
    %409 = vector.shape_cast %398 : vector<2x4x6xf32> to vector<2x1x4x6xf32>
    tpu.vector_store %arg6[%c0_154, %c0_155, %c0_156, %c0_157], %409 {strides = array<i32>} : memref<2x3x4x6xf32, #tpu.memory_space<vmem>>, vector<2x1x4x6xf32>,
    %c0_158 = arith.constant 0 : index
    %c1_159 = arith.constant 1 : index
    %c0_160 = arith.constant 0 : index
    %c0_161 = arith.constant 0 : index
    %410 = vector.load %arg6[%c0_158, %c1_159, %c0_160, %c0_161] : memref<2x3x4x6xf32, #tpu.memory_space<vmem>>, vector<2x1x4x6xf32>
    %411 = vector.shape_cast %410 : vector<2x1x4x6xf32> to vector<2x4x6xf32>
    %412 = vector.shape_cast %402 : vector<2x4x6xf32> to vector<2x1x4x6xf32>
    tpu.vector_store %arg6[%c0_158, %c1_159, %c0_160, %c0_161], %412 {strides = array<i32>} : memref<2x3x4x6xf32, #tpu.memory_space<vmem>>, vector<2x1x4x6xf32>,
    %c0_162 = arith.constant 0 : index
    %c2_163 = arith.constant 2 : index
    %c0_164 = arith.constant 0 : index
    %c0_165 = arith.constant 0 : index
    %413 = vector.load %arg6[%c0_162, %c2_163, %c0_164, %c0_165] : memref<2x3x4x6xf32, #tpu.memory_space<vmem>>, vector<2x1x4x6xf32>
    %414 = vector.shape_cast %413 : vector<2x1x4x6xf32> to vector<2x4x6xf32>
    %415 = vector.shape_cast %406 : vector<2x4x6xf32> to vector<2x1x4x6xf32>
    tpu.vector_store %arg6[%c0_162, %c2_163, %c0_164, %c0_165], %415 {strides = array<i32>} : memref<2x3x4x6xf32, #tpu.memory_space<vmem>>, vector<2x1x4x6xf32>,
    %c0_166 = arith.constant 0 : index
    %416 = memref.load %arg4[%c0_166] : memref<3xf32, #tpu.memory_space<smem>>
    %417 = vector.broadcast %416 : f32 to vector<2x4x6xf32>
    %c1_167 = arith.constant 1 : index
    %418 = memref.load %arg4[%c1_167] : memref<3xf32, #tpu.memory_space<smem>>
    %419 = vector.broadcast %418 : f32 to vector<2x4x6xf32>
    %c2_168 = arith.constant 2 : index
    %420 = memref.load %arg4[%c2_168] : memref<3xf32, #tpu.memory_space<smem>>
    %421 = vector.broadcast %420 : f32 to vector<2x4x6xf32>
    %cst_169 = arith.constant 0.000000e+00 : f32
    %422 = vector.broadcast %cst_169 : f32 to vector<2x4x5xf32>
    %cst_170 = arith.constant 0.000000e+00 : f32
    %423 = vector.broadcast %cst_170 : f32 to vector<2x4x5xf32>
    %cst_171 = arith.constant 0.000000e+00 : f32
    %424 = vector.broadcast %cst_171 : f32 to vector<2x4x5xf32>
    %cst_172 = arith.constant 0.000000e+00 : f32
    %425 = vector.broadcast %cst_172 : f32 to vector<2x4x5xf32>
    %cst_173 = arith.constant 0.000000e+00 : f32
    %426 = vector.broadcast %cst_173 : f32 to vector<2x4x5xf32>
    %cst_174 = arith.constant 0.000000e+00 : f32
    %427 = vector.broadcast %cst_174 : f32 to vector<2x4x5xf32>
    %428 = vector.extract_strided_slice %398 {offsets = [0, 0, 0], sizes = [2, 4, 5], strides = [1, 1, 1]} : vector<2x4x6xf32> to vector<2x4x5xf32>
    %429 = vector.extract_strided_slice %398 {offsets = [0, 0, 1], sizes = [2, 4, 5], strides = [1, 1, 1]} : vector<2x4x6xf32> to vector<2x4x5xf32>
    %c1_175 = arith.constant 1 : index
    %430 = memref.load %arg3[%c1_175] : memref<27xf32, #tpu.memory_space<smem>>
    %431 = vector.broadcast %430 : f32 to vector<2x4x6xf32>
    %432 = arith.mulf %431, %398 : vector<2x4x6xf32>
    %433 = arith.addf %417, %432 : vector<2x4x6xf32>
    %c0_176 = arith.constant 0 : index
    %434 = memref.load %arg3[%c0_176] : memref<27xf32, #tpu.memory_space<smem>>
    %435 = vector.broadcast %434 : f32 to vector<2x4x5xf32>
    %436 = arith.mulf %435, %428 : vector<2x4x5xf32>
    %437 = arith.addf %422, %436 : vector<2x4x5xf32>
    %c2_177 = arith.constant 2 : index
    %438 = memref.load %arg3[%c2_177] : memref<27xf32, #tpu.memory_space<smem>>
    %439 = vector.broadcast %438 : f32 to vector<2x4x5xf32>
    %440 = arith.mulf %439, %429 : vector<2x4x5xf32>
    %441 = arith.addf %425, %440 : vector<2x4x5xf32>
    %c10_178 = arith.constant 10 : index
    %442 = memref.load %arg3[%c10_178] : memref<27xf32, #tpu.memory_space<smem>>
    %443 = vector.broadcast %442 : f32 to vector<2x4x6xf32>
    %444 = arith.mulf %443, %398 : vector<2x4x6xf32>
    %445 = arith.addf %419, %444 : vector<2x4x6xf32>
    %c9_179 = arith.constant 9 : index
    %446 = memref.load %arg3[%c9_179] : memref<27xf32, #tpu.memory_space<smem>>
    %447 = vector.broadcast %446 : f32 to vector<2x4x5xf32>
    %448 = arith.mulf %447, %428 : vector<2x4x5xf32>
    %449 = arith.addf %423, %448 : vector<2x4x5xf32>
    %c11_180 = arith.constant 11 : index
    %450 = memref.load %arg3[%c11_180] : memref<27xf32, #tpu.memory_space<smem>>
    %451 = vector.broadcast %450 : f32 to vector<2x4x5xf32>
    %452 = arith.mulf %451, %429 : vector<2x4x5xf32>
    %453 = arith.addf %426, %452 : vector<2x4x5xf32>
    %c19_181 = arith.constant 19 : index
    %454 = memref.load %arg3[%c19_181] : memref<27xf32, #tpu.memory_space<smem>>
    %455 = vector.broadcast %454 : f32 to vector<2x4x6xf32>
    %456 = arith.mulf %455, %398 : vector<2x4x6xf32>
    %457 = arith.addf %421, %456 : vector<2x4x6xf32>
    %c18_182 = arith.constant 18 : index
    %458 = memref.load %arg3[%c18_182] : memref<27xf32, #tpu.memory_space<smem>>
    %459 = vector.broadcast %458 : f32 to vector<2x4x5xf32>
    %460 = arith.mulf %459, %428 : vector<2x4x5xf32>
    %461 = arith.addf %424, %460 : vector<2x4x5xf32>
    %c20_183 = arith.constant 20 : index
    %462 = memref.load %arg3[%c20_183] : memref<27xf32, #tpu.memory_space<smem>>
    %463 = vector.broadcast %462 : f32 to vector<2x4x5xf32>
    %464 = arith.mulf %463, %429 : vector<2x4x5xf32>
    %465 = arith.addf %427, %464 : vector<2x4x5xf32>
    %466 = vector.extract_strided_slice %402 {offsets = [0, 0, 0], sizes = [2, 4, 5], strides = [1, 1, 1]} : vector<2x4x6xf32> to vector<2x4x5xf32>
    %467 = vector.extract_strided_slice %402 {offsets = [0, 0, 1], sizes = [2, 4, 5], strides = [1, 1, 1]} : vector<2x4x6xf32> to vector<2x4x5xf32>
    %c4_184 = arith.constant 4 : index
    %468 = memref.load %arg3[%c4_184] : memref<27xf32, #tpu.memory_space<smem>>
    %469 = vector.broadcast %468 : f32 to vector<2x4x6xf32>
    %470 = arith.mulf %469, %402 : vector<2x4x6xf32>
    %471 = arith.addf %433, %470 : vector<2x4x6xf32>
    %c3_185 = arith.constant 3 : index
    %472 = memref.load %arg3[%c3_185] : memref<27xf32, #tpu.memory_space<smem>>
    %473 = vector.broadcast %472 : f32 to vector<2x4x5xf32>
    %474 = arith.mulf %473, %466 : vector<2x4x5xf32>
    %475 = arith.addf %437, %474 : vector<2x4x5xf32>
    %c5_186 = arith.constant 5 : index
    %476 = memref.load %arg3[%c5_186] : memref<27xf32, #tpu.memory_space<smem>>
    %477 = vector.broadcast %476 : f32 to vector<2x4x5xf32>
    %478 = arith.mulf %477, %467 : vector<2x4x5xf32>
    %479 = arith.addf %441, %478 : vector<2x4x5xf32>
    %c13_187 = arith.constant 13 : index
    %480 = memref.load %arg3[%c13_187] : memref<27xf32, #tpu.memory_space<smem>>
    %481 = vector.broadcast %480 : f32 to vector<2x4x6xf32>
    %482 = arith.mulf %481, %402 : vector<2x4x6xf32>
    %483 = arith.addf %445, %482 : vector<2x4x6xf32>
    %c12_188 = arith.constant 12 : index
    %484 = memref.load %arg3[%c12_188] : memref<27xf32, #tpu.memory_space<smem>>
    %485 = vector.broadcast %484 : f32 to vector<2x4x5xf32>
    %486 = arith.mulf %485, %466 : vector<2x4x5xf32>
    %487 = arith.addf %449, %486 : vector<2x4x5xf32>
    %c14_189 = arith.constant 14 : index
    %488 = memref.load %arg3[%c14_189] : memref<27xf32, #tpu.memory_space<smem>>
    %489 = vector.broadcast %488 : f32 to vector<2x4x5xf32>
    %490 = arith.mulf %489, %467 : vector<2x4x5xf32>
    %491 = arith.addf %453, %490 : vector<2x4x5xf32>
    %c22_190 = arith.constant 22 : index
    %492 = memref.load %arg3[%c22_190] : memref<27xf32, #tpu.memory_space<smem>>
    %493 = vector.broadcast %492 : f32 to vector<2x4x6xf32>
    %494 = arith.mulf %493, %402 : vector<2x4x6xf32>
    %495 = arith.addf %457, %494 : vector<2x4x6xf32>
    %c21_191 = arith.constant 21 : index
    %496 = memref.load %arg3[%c21_191] : memref<27xf32, #tpu.memory_space<smem>>
    %497 = vector.broadcast %496 : f32 to vector<2x4x5xf32>
    %498 = arith.mulf %497, %466 : vector<2x4x5xf32>
    %499 = arith.addf %461, %498 : vector<2x4x5xf32>
    %c23_192 = arith.constant 23 : index
    %500 = memref.load %arg3[%c23_192] : memref<27xf32, #tpu.memory_space<smem>>
    %501 = vector.broadcast %500 : f32 to vector<2x4x5xf32>
    %502 = arith.mulf %501, %467 : vector<2x4x5xf32>
    %503 = arith.addf %465, %502 : vector<2x4x5xf32>
    %504 = vector.extract_strided_slice %406 {offsets = [0, 0, 0], sizes = [2, 4, 5], strides = [1, 1, 1]} : vector<2x4x6xf32> to vector<2x4x5xf32>
    %505 = vector.extract_strided_slice %406 {offsets = [0, 0, 1], sizes = [2, 4, 5], strides = [1, 1, 1]} : vector<2x4x6xf32> to vector<2x4x5xf32>
    %c7_193 = arith.constant 7 : index
    %506 = memref.load %arg3[%c7_193] : memref<27xf32, #tpu.memory_space<smem>>
    %507 = vector.broadcast %506 : f32 to vector<2x4x6xf32>
    %508 = arith.mulf %507, %406 : vector<2x4x6xf32>
    %509 = arith.addf %471, %508 : vector<2x4x6xf32>
    %c6_194 = arith.constant 6 : index
    %510 = memref.load %arg3[%c6_194] : memref<27xf32, #tpu.memory_space<smem>>
    %511 = vector.broadcast %510 : f32 to vector<2x4x5xf32>
    %512 = arith.mulf %511, %504 : vector<2x4x5xf32>
    %513 = arith.addf %475, %512 : vector<2x4x5xf32>
    %c8_195 = arith.constant 8 : index
    %514 = memref.load %arg3[%c8_195] : memref<27xf32, #tpu.memory_space<smem>>
    %515 = vector.broadcast %514 : f32 to vector<2x4x5xf32>
    %516 = arith.mulf %515, %505 : vector<2x4x5xf32>
    %517 = arith.addf %479, %516 : vector<2x4x5xf32>
    %c16_196 = arith.constant 16 : index
    %518 = memref.load %arg3[%c16_196] : memref<27xf32, #tpu.memory_space<smem>>
    %519 = vector.broadcast %518 : f32 to vector<2x4x6xf32>
    %520 = arith.mulf %519, %406 : vector<2x4x6xf32>
    %521 = arith.addf %483, %520 : vector<2x4x6xf32>
    %c15_197 = arith.constant 15 : index
    %522 = memref.load %arg3[%c15_197] : memref<27xf32, #tpu.memory_space<smem>>
    %523 = vector.broadcast %522 : f32 to vector<2x4x5xf32>
    %524 = arith.mulf %523, %504 : vector<2x4x5xf32>
    %525 = arith.addf %487, %524 : vector<2x4x5xf32>
    %c17_198 = arith.constant 17 : index
    %526 = memref.load %arg3[%c17_198] : memref<27xf32, #tpu.memory_space<smem>>
    %527 = vector.broadcast %526 : f32 to vector<2x4x5xf32>
    %528 = arith.mulf %527, %505 : vector<2x4x5xf32>
    %529 = arith.addf %491, %528 : vector<2x4x5xf32>
    %c25_199 = arith.constant 25 : index
    %530 = memref.load %arg3[%c25_199] : memref<27xf32, #tpu.memory_space<smem>>
    %531 = vector.broadcast %530 : f32 to vector<2x4x6xf32>
    %532 = arith.mulf %531, %406 : vector<2x4x6xf32>
    %533 = arith.addf %495, %532 : vector<2x4x6xf32>
    %c24_200 = arith.constant 24 : index
    %534 = memref.load %arg3[%c24_200] : memref<27xf32, #tpu.memory_space<smem>>
    %535 = vector.broadcast %534 : f32 to vector<2x4x5xf32>
    %536 = arith.mulf %535, %504 : vector<2x4x5xf32>
    %537 = arith.addf %499, %536 : vector<2x4x5xf32>
    %c26_201 = arith.constant 26 : index
    %538 = memref.load %arg3[%c26_201] : memref<27xf32, #tpu.memory_space<smem>>
    %539 = vector.broadcast %538 : f32 to vector<2x4x5xf32>
    %540 = arith.mulf %539, %505 : vector<2x4x5xf32>
    %541 = arith.addf %503, %540 : vector<2x4x5xf32>
    %542 = vector.extract_strided_slice %9 {offsets = [0, 0, 3], sizes = [2, 4, 3], strides = [1, 1, 1]} : vector<2x4x6xf32> to vector<2x4x3xf32>
    %543 = vector.extract_strided_slice %9 {offsets = [0, 0, 0], sizes = [2, 4, 3], strides = [1, 1, 1]} : vector<2x4x6xf32> to vector<2x4x3xf32>
    %544 = arith.addf %543, %542 : vector<2x4x3xf32>
    %c0_202 = arith.constant 0 : index
    %c0_203 = arith.constant 0 : index
    %c0_204 = arith.constant 0 : index
    %c0_205 = arith.constant 0 : index
    %545 = vector.load %arg5[%c0_202, %c0_203, %c0_204, %c0_205] : memref<2x3x4x12xf32, #tpu.memory_space<vmem>>, vector<2x1x4x3xf32>
    %546 = vector.shape_cast %545 : vector<2x1x4x3xf32> to vector<2x4x3xf32>
    %547 = vector.shape_cast %544 : vector<2x4x3xf32> to vector<2x1x4x3xf32>
    tpu.vector_store %arg5[%c0_202, %c0_203, %c0_204, %c0_205], %547 {strides = array<i32>} : memref<2x3x4x12xf32, #tpu.memory_space<vmem>>, vector<2x1x4x3xf32>,
    %c0_206 = arith.constant 0 : index
    %c0_207 = arith.constant 0 : index
    %c0_208 = arith.constant 0 : index
    %c9_209 = arith.constant 9 : index
    %548 = vector.load %arg5[%c0_206, %c0_207, %c0_208, %c9_209] : memref<2x3x4x12xf32, #tpu.memory_space<vmem>>, vector<2x1x4x3xf32>
    %549 = vector.shape_cast %548 : vector<2x1x4x3xf32> to vector<2x4x3xf32>
    %550 = vector.shape_cast %542 : vector<2x4x3xf32> to vector<2x1x4x3xf32>
    tpu.vector_store %arg5[%c0_206, %c0_207, %c0_208, %c9_209], %550 {strides = array<i32>} : memref<2x3x4x12xf32, #tpu.memory_space<vmem>>, vector<2x1x4x3xf32>,
    %c0_210 = arith.constant 0 : index
    %c0_211 = arith.constant 0 : index
    %c0_212 = arith.constant 0 : index
    %c3_213 = arith.constant 3 : index
    %551 = vector.load %arg5[%c0_210, %c0_211, %c0_212, %c3_213] : memref<2x3x4x12xf32, #tpu.memory_space<vmem>>, vector<2x1x4x6xf32>
    %552 = vector.shape_cast %551 : vector<2x1x4x6xf32> to vector<2x4x6xf32>
    %553 = vector.shape_cast %509 : vector<2x4x6xf32> to vector<2x1x4x6xf32>
    tpu.vector_store %arg5[%c0_210, %c0_211, %c0_212, %c3_213], %553 {strides = array<i32>} : memref<2x3x4x12xf32, #tpu.memory_space<vmem>>, vector<2x1x4x6xf32>,
    %c0_214 = arith.constant 0 : index
    %c0_215 = arith.constant 0 : index
    %c0_216 = arith.constant 0 : index
    %c4_217 = arith.constant 4 : index
    %554 = vector.load %arg5[%c0_214, %c0_215, %c0_216, %c4_217] : memref<2x3x4x12xf32, #tpu.memory_space<vmem>>, vector<2x1x4x5xf32>
    %555 = vector.shape_cast %554 : vector<2x1x4x5xf32> to vector<2x4x5xf32>
    %556 = arith.addf %555, %513 : vector<2x4x5xf32>
    %c0_218 = arith.constant 0 : index
    %c0_219 = arith.constant 0 : index
    %c0_220 = arith.constant 0 : index
    %c4_221 = arith.constant 4 : index
    %557 = vector.load %arg5[%c0_218, %c0_219, %c0_220, %c4_221] : memref<2x3x4x12xf32, #tpu.memory_space<vmem>>, vector<2x1x4x5xf32>
    %558 = vector.shape_cast %557 : vector<2x1x4x5xf32> to vector<2x4x5xf32>
    %559 = vector.shape_cast %556 : vector<2x4x5xf32> to vector<2x1x4x5xf32>
    tpu.vector_store %arg5[%c0_218, %c0_219, %c0_220, %c4_221], %559 {strides = array<i32>} : memref<2x3x4x12xf32, #tpu.memory_space<vmem>>, vector<2x1x4x5xf32>,
    %c0_222 = arith.constant 0 : index
    %c0_223 = arith.constant 0 : index
    %c0_224 = arith.constant 0 : index
    %c3_225 = arith.constant 3 : index
    %560 = vector.load %arg5[%c0_222, %c0_223, %c0_224, %c3_225] : memref<2x3x4x12xf32, #tpu.memory_space<vmem>>, vector<2x1x4x5xf32>
    %561 = vector.shape_cast %560 : vector<2x1x4x5xf32> to vector<2x4x5xf32>
    %562 = arith.addf %561, %517 : vector<2x4x5xf32>
    %c0_226 = arith.constant 0 : index
    %c0_227 = arith.constant 0 : index
    %c0_228 = arith.constant 0 : index
    %c3_229 = arith.constant 3 : index
    %563 = vector.load %arg5[%c0_226, %c0_227, %c0_228, %c3_229] : memref<2x3x4x12xf32, #tpu.memory_space<vmem>>, vector<2x1x4x5xf32>
    %564 = vector.shape_cast %563 : vector<2x1x4x5xf32> to vector<2x4x5xf32>
    %565 = vector.shape_cast %562 : vector<2x4x5xf32> to vector<2x1x4x5xf32>
    tpu.vector_store %arg5[%c0_226, %c0_227, %c0_228, %c3_229], %565 {strides = array<i32>} : memref<2x3x4x12xf32, #tpu.memory_space<vmem>>, vector<2x1x4x5xf32>,
    %566 = vector.extract_strided_slice %14 {offsets = [0, 0, 3], sizes = [2, 4, 3], strides = [1, 1, 1]} : vector<2x4x6xf32> to vector<2x4x3xf32>
    %567 = vector.extract_strided_slice %14 {offsets = [0, 0, 0], sizes = [2, 4, 3], strides = [1, 1, 1]} : vector<2x4x6xf32> to vector<2x4x3xf32>
    %568 = arith.addf %567, %566 : vector<2x4x3xf32>
    %c0_230 = arith.constant 0 : index
    %c1_231 = arith.constant 1 : index
    %c0_232 = arith.constant 0 : index
    %c0_233 = arith.constant 0 : index
    %569 = vector.load %arg5[%c0_230, %c1_231, %c0_232, %c0_233] : memref<2x3x4x12xf32, #tpu.memory_space<vmem>>, vector<2x1x4x3xf32>
    %570 = vector.shape_cast %569 : vector<2x1x4x3xf32> to vector<2x4x3xf32>
    %571 = vector.shape_cast %568 : vector<2x4x3xf32> to vector<2x1x4x3xf32>
    tpu.vector_store %arg5[%c0_230, %c1_231, %c0_232, %c0_233], %571 {strides = array<i32>} : memref<2x3x4x12xf32, #tpu.memory_space<vmem>>, vector<2x1x4x3xf32>,
    %c0_234 = arith.constant 0 : index
    %c1_235 = arith.constant 1 : index
    %c0_236 = arith.constant 0 : index
    %c9_237 = arith.constant 9 : index
    %572 = vector.load %arg5[%c0_234, %c1_235, %c0_236, %c9_237] : memref<2x3x4x12xf32, #tpu.memory_space<vmem>>, vector<2x1x4x3xf32>
    %573 = vector.shape_cast %572 : vector<2x1x4x3xf32> to vector<2x4x3xf32>
    %574 = vector.shape_cast %566 : vector<2x4x3xf32> to vector<2x1x4x3xf32>
    tpu.vector_store %arg5[%c0_234, %c1_235, %c0_236, %c9_237], %574 {strides = array<i32>} : memref<2x3x4x12xf32, #tpu.memory_space<vmem>>, vector<2x1x4x3xf32>,
    %c0_238 = arith.constant 0 : index
    %c1_239 = arith.constant 1 : index
    %c0_240 = arith.constant 0 : index
    %c3_241 = arith.constant 3 : index
    %575 = vector.load %arg5[%c0_238, %c1_239, %c0_240, %c3_241] : memref<2x3x4x12xf32, #tpu.memory_space<vmem>>, vector<2x1x4x6xf32>
    %576 = vector.shape_cast %575 : vector<2x1x4x6xf32> to vector<2x4x6xf32>
    %577 = vector.shape_cast %521 : vector<2x4x6xf32> to vector<2x1x4x6xf32>
    tpu.vector_store %arg5[%c0_238, %c1_239, %c0_240, %c3_241], %577 {strides = array<i32>} : memref<2x3x4x12xf32, #tpu.memory_space<vmem>>, vector<2x1x4x6xf32>,
    %c0_242 = arith.constant 0 : index
    %c1_243 = arith.constant 1 : index
    %c0_244 = arith.constant 0 : index
    %c4_245 = arith.constant 4 : index
    %578 = vector.load %arg5[%c0_242, %c1_243, %c0_244, %c4_245] : memref<2x3x4x12xf32, #tpu.memory_space<vmem>>, vector<2x1x4x5xf32>
    %579 = vector.shape_cast %578 : vector<2x1x4x5xf32> to vector<2x4x5xf32>
    %580 = arith.addf %579, %525 : vector<2x4x5xf32>
    %c0_246 = arith.constant 0 : index
    %c1_247 = arith.constant 1 : index
    %c0_248 = arith.constant 0 : index
    %c4_249 = arith.constant 4 : index
    %581 = vector.load %arg5[%c0_246, %c1_247, %c0_248, %c4_249] : memref<2x3x4x12xf32, #tpu.memory_space<vmem>>, vector<2x1x4x5xf32>
    %582 = vector.shape_cast %581 : vector<2x1x4x5xf32> to vector<2x4x5xf32>
    %583 = vector.shape_cast %580 : vector<2x4x5xf32> to vector<2x1x4x5xf32>
    tpu.vector_store %arg5[%c0_246, %c1_247, %c0_248, %c4_249], %583 {strides = array<i32>} : memref<2x3x4x12xf32, #tpu.memory_space<vmem>>, vector<2x1x4x5xf32>,
    %c0_250 = arith.constant 0 : index
    %c1_251 = arith.constant 1 : index
    %c0_252 = arith.constant 0 : index
    %c3_253 = arith.constant 3 : index
    %584 = vector.load %arg5[%c0_250, %c1_251, %c0_252, %c3_253] : memref<2x3x4x12xf32, #tpu.memory_space<vmem>>, vector<2x1x4x5xf32>
    %585 = vector.shape_cast %584 : vector<2x1x4x5xf32> to vector<2x4x5xf32>
    %586 = arith.addf %585, %529 : vector<2x4x5xf32>
    %c0_254 = arith.constant 0 : index
    %c1_255 = arith.constant 1 : index
    %c0_256 = arith.constant 0 : index
    %c3_257 = arith.constant 3 : index
    %587 = vector.load %arg5[%c0_254, %c1_255, %c0_256, %c3_257] : memref<2x3x4x12xf32, #tpu.memory_space<vmem>>, vector<2x1x4x5xf32>
    %588 = vector.shape_cast %587 : vector<2x1x4x5xf32> to vector<2x4x5xf32>
    %589 = vector.shape_cast %586 : vector<2x4x5xf32> to vector<2x1x4x5xf32>
    tpu.vector_store %arg5[%c0_254, %c1_255, %c0_256, %c3_257], %589 {strides = array<i32>} : memref<2x3x4x12xf32, #tpu.memory_space<vmem>>, vector<2x1x4x5xf32>,
    %590 = vector.extract_strided_slice %19 {offsets = [0, 0, 3], sizes = [2, 4, 3], strides = [1, 1, 1]} : vector<2x4x6xf32> to vector<2x4x3xf32>
    %591 = vector.extract_strided_slice %19 {offsets = [0, 0, 0], sizes = [2, 4, 3], strides = [1, 1, 1]} : vector<2x4x6xf32> to vector<2x4x3xf32>
    %592 = arith.addf %591, %590 : vector<2x4x3xf32>
    %c0_258 = arith.constant 0 : index
    %c2_259 = arith.constant 2 : index
    %c0_260 = arith.constant 0 : index
    %c0_261 = arith.constant 0 : index
    %593 = vector.load %arg5[%c0_258, %c2_259, %c0_260, %c0_261] : memref<2x3x4x12xf32, #tpu.memory_space<vmem>>, vector<2x1x4x3xf32>
    %594 = vector.shape_cast %593 : vector<2x1x4x3xf32> to vector<2x4x3xf32>
    %595 = vector.shape_cast %592 : vector<2x4x3xf32> to vector<2x1x4x3xf32>
    tpu.vector_store %arg5[%c0_258, %c2_259, %c0_260, %c0_261], %595 {strides = array<i32>} : memref<2x3x4x12xf32, #tpu.memory_space<vmem>>, vector<2x1x4x3xf32>,
    %c0_262 = arith.constant 0 : index
    %c2_263 = arith.constant 2 : index
    %c0_264 = arith.constant 0 : index
    %c9_265 = arith.constant 9 : index
    %596 = vector.load %arg5[%c0_262, %c2_263, %c0_264, %c9_265] : memref<2x3x4x12xf32, #tpu.memory_space<vmem>>, vector<2x1x4x3xf32>
    %597 = vector.shape_cast %596 : vector<2x1x4x3xf32> to vector<2x4x3xf32>
    %598 = vector.shape_cast %590 : vector<2x4x3xf32> to vector<2x1x4x3xf32>
    tpu.vector_store %arg5[%c0_262, %c2_263, %c0_264, %c9_265], %598 {strides = array<i32>} : memref<2x3x4x12xf32, #tpu.memory_space<vmem>>, vector<2x1x4x3xf32>,
    %c0_266 = arith.constant 0 : index
    %c2_267 = arith.constant 2 : index
    %c0_268 = arith.constant 0 : index
    %c3_269 = arith.constant 3 : index
    %599 = vector.load %arg5[%c0_266, %c2_267, %c0_268, %c3_269] : memref<2x3x4x12xf32, #tpu.memory_space<vmem>>, vector<2x1x4x6xf32>
    %600 = vector.shape_cast %599 : vector<2x1x4x6xf32> to vector<2x4x6xf32>
    %601 = vector.shape_cast %533 : vector<2x4x6xf32> to vector<2x1x4x6xf32>
    tpu.vector_store %arg5[%c0_266, %c2_267, %c0_268, %c3_269], %601 {strides = array<i32>} : memref<2x3x4x12xf32, #tpu.memory_space<vmem>>, vector<2x1x4x6xf32>,
    %c0_270 = arith.constant 0 : index
    %c2_271 = arith.constant 2 : index
    %c0_272 = arith.constant 0 : index
    %c4_273 = arith.constant 4 : index
    %602 = vector.load %arg5[%c0_270, %c2_271, %c0_272, %c4_273] : memref<2x3x4x12xf32, #tpu.memory_space<vmem>>, vector<2x1x4x5xf32>
    %603 = vector.shape_cast %602 : vector<2x1x4x5xf32> to vector<2x4x5xf32>
    %604 = arith.addf %603, %537 : vector<2x4x5xf32>
    %c0_274 = arith.constant 0 : index
    %c2_275 = arith.constant 2 : index
    %c0_276 = arith.constant 0 : index
    %c4_277 = arith.constant 4 : index
    %605 = vector.load %arg5[%c0_274, %c2_275, %c0_276, %c4_277] : memref<2x3x4x12xf32, #tpu.memory_space<vmem>>, vector<2x1x4x5xf32>
    %606 = vector.shape_cast %605 : vector<2x1x4x5xf32> to vector<2x4x5xf32>
    %607 = vector.shape_cast %604 : vector<2x4x5xf32> to vector<2x1x4x5xf32>
    tpu.vector_store %arg5[%c0_274, %c2_275, %c0_276, %c4_277], %607 {strides = array<i32>} : memref<2x3x4x12xf32, #tpu.memory_space<vmem>>, vector<2x1x4x5xf32>,
    %c0_278 = arith.constant 0 : index
    %c2_279 = arith.constant 2 : index
    %c0_280 = arith.constant 0 : index
    %c3_281 = arith.constant 3 : index
    %608 = vector.load %arg5[%c0_278, %c2_279, %c0_280, %c3_281] : memref<2x3x4x12xf32, #tpu.memory_space<vmem>>, vector<2x1x4x5xf32>
    %609 = vector.shape_cast %608 : vector<2x1x4x5xf32> to vector<2x4x5xf32>
    %610 = arith.addf %609, %541 : vector<2x4x5xf32>
    %c0_282 = arith.constant 0 : index
    %c2_283 = arith.constant 2 : index
    %c0_284 = arith.constant 0 : index
    %c3_285 = arith.constant 3 : index
    %611 = vector.load %arg5[%c0_282, %c2_283, %c0_284, %c3_285] : memref<2x3x4x12xf32, #tpu.memory_space<vmem>>, vector<2x1x4x5xf32>
    %612 = vector.shape_cast %611 : vector<2x1x4x5xf32> to vector<2x4x5xf32>
    %613 = vector.shape_cast %610 : vector<2x4x5xf32> to vector<2x1x4x5xf32>
    tpu.vector_store %arg5[%c0_282, %c2_283, %c0_284, %c3_285], %613 {strides = array<i32>} : memref<2x3x4x12xf32, #tpu.memory_space<vmem>>, vector<2x1x4x5xf32>,
    return
  }
}

</mosaic_0001>

<bundles_post_ra>
// kernel: model_forward.1
= control target key start
LH: loop header
LB: loop body
LE: loop exit
PB: predicated region body
PF: predicated region fallthrough
CT: control target
= control target key end

     0   :  { %s2702_s0 = inlined_call_operand.vmem [shape: f32[2,3,4,6], index: 0, kind: input, shape index: {}]   ;;  %s2703_s1 = inlined_call_operand.vmem [shape: f32[81], index: 1, kind: input, shape index: {}]   ;;  %s2704_s2 = inlined_call_operand.vmem [shape: f32[3], index: 2, kind: input, shape index: {}]   ;;  %s2705_s3 = inlined_call_operand.vmem [shape: f32[27], index: 3, kind: input, shape index: {}]   ;;  %s2706_s4 = inlined_call_operand.vmem [shape: f32[3], index: 4, kind: input, shape index: {}]   ;;  %s2707_s5 = inlined_call_operand.hbm [shape: f32[2,3,4,12], index: 5, kind: output, shape index: {0}]   ;;  %s2708_s6 = inlined_call_operand.hbm [shape: f32[2,3,4,6], index: 6, kind: output, shape index: {1}]  }
   0x1   :  { %2710 = sst [smem:[#allocation19_spill]] %s2707_s5 }
   0x2   :  { %12 = vsyncpa [#allocation5], 0 }
   0x3   :  { %13 = vsyncpa [#allocation7], 0 }
   0x4   :  { %14 = vsyncpa [#allocation10], 0 }
   0x5   :  { %15 = vsyncpa [#allocation4], 0  ;;  %s35_s23 = sshll.u32 %s2704_s2, 4  ;;  %s36_s23 = int_to_ptr.vmem [resolvable:$true] %s35_s23 }
   0x6   :  { %16 = vsyncpa [#allocation13], 0  ;;  %s25_s26 = sshll.u32 %s2703_s1, 4  ;;  %s1605_s27 = scalar_lea.vmem %s36_s23, 16  ;;  %s26_s26 = int_to_ptr.vmem [resolvable:$true] %s25_s26 }
   0x7   :  { %p1606_p0 = scmp.ne.s32.totalorder %s36_s23, %s1605_s27  ;;  %p1610_p1 = scmp.lt.s32.totalorder %s36_s23, %s36_s23 }
   0x8   :  { %p1611_p2 = scmp.lt.s32.totalorder %s1605_s27, %s1605_s27 }
   0xa   :  { %p1612_p3 = por %p1611_p2, %p1610_p1 }
   0xc   :  { %p1613_p4 = pnand %p1612_p3, %p1606_p0 }
   0xe   :  { %1616 = shalt.err (!%p1613_p4)
}
   0xf   :  { %s1707_s28 = smov [#allocation6]   ;;  %s1617_s29 = scalar_lea.vmem %s26_s26, 16 }
  0x10   :  { %38 = dma.vmem_to_smem %s36_s23, 16, %s1707_s28, [#allocation7]  }
  0x11   :  { %p1618_p5 = scmp.ne.s32.totalorder %s26_s26, %s1617_s29  ;;  %p1622_p6 = scmp.lt.s32.totalorder %s26_s26, %s26_s26 }
  0x12   :  { %p1623_p7 = scmp.lt.s32.totalorder %s1617_s29, %s1617_s29 }
  0x14   :  { %p1624_p8 = por %p1623_p7, %p1622_p6 }
  0x16   :  { %p1625_p9 = pnand %p1624_p8, %p1618_p5 }
  0x18   :  { %1628 = shalt.err (!%p1625_p9)
}
  0x19   :  { %s1708_s2 = smov [#allocation3]   ;;  %s45_s7 = sshll.u32 %s2705_s3, 4  ;;  %s46_s7 = int_to_ptr.vmem [resolvable:$true] %s45_s7 }
  0x1a   :  { %28 = dma.vmem_to_smem %s26_s26, 16, %s1708_s2, [#allocation5]  }
  0x1b   :  { %s55_s10 = sshll.u32 %s2706_s4, 4  ;;  %s1629_s11 = scalar_lea.vmem %s46_s7, 16  ;;  %s56_s10 = int_to_ptr.vmem [resolvable:$true] %s55_s10 }
  0x1c   :  { %p1630_p10 = scmp.ne.s32.totalorder %s46_s7, %s1629_s11  ;;  %p1634_p11 = scmp.lt.s32.totalorder %s46_s7, %s46_s7 }
  0x1d   :  { %p1635_p12 = scmp.lt.s32.totalorder %s1629_s11, %s1629_s11 }
  0x1f   :  { %p1636_p13 = por %p1635_p12, %p1634_p11 }
  0x21   :  { %p1637_p0 = pnand %p1636_p13, %p1630_p10 }
  0x23   :  { %1640 = shalt.err (!%p1637_p0)
}
  0x24   :  { %s1709_s12 = smov [#allocation8]   ;;  %s1641_s13 = scalar_lea.vmem %s56_s10, 16 }
  0x25   :  { %48 = dma.vmem_to_smem %s46_s7, 16, %s1709_s12, [#allocation7]  }
  0x26   :  { %p1642_p1 = scmp.ne.s32.totalorder %s56_s10, %s1641_s13  ;;  %p1646_p2 = scmp.lt.s32.totalorder %s56_s10, %s56_s10 }
  0x27   :  { %p1647_p3 = scmp.lt.s32.totalorder %s1641_s13, %s1641_s13 }
  0x29   :  { %p1648_p4 = por %p1647_p3, %p1646_p2 }
  0x2b   :  { %p1649_p5 = pnand %p1648_p4, %p1642_p1 }
  0x2d   :  { %1652 = shalt.err (!%p1649_p5)
}
  0x2e   :  { %s1710_s3 = smov [#allocation9]  }
  0x2f   :  { %58 = dma.vmem_to_smem %s56_s10, 16, %s1710_s3, [#allocation10]  }
  0x30   :  { %1697 = dma.done.wait [#allocation5], 16  }
  0x31   :  { %1698 = vsyncadd [#allocation5], 4294967280 }
  0x32   :  { %1699 = dma.done.wait [#allocation7], 32  }
  0x33   :  { %1700 = vsyncadd [#allocation7], 4294967264 }
  0x34   :  { %1701 = dma.done.wait [#allocation10], 16  }
  0x35   :  { %1702 = vsyncadd [#allocation10], 4294967280 }
  0x36   :  { %71 = sfence }
  0x37   :  { %v99_v0 = vld [vmem:[%s2702_s0] sm:$0xf]  ;;  %s1711_s15 = smov 1   ;;  %v1469_v1 = vld [vmem:[%s2702_s0 + $0x4] sm:$0xf]  ;;  %vm72_vm0 = vcmask 57344  }
  0x38   :  { %103 = vrot.lane.b32.xlu0 %v99_v0, %s1711_s15  ;;  %v100_v2 = vld [vmem:[%s2702_s0 + $0xc] sm:$0xf]  ;;  %117 = vrot.lane.b32.xlu1 %v1469_v1, %s1711_s15  ;;  %v1712_v3 = vmov 0.0   ;;  %vm85_vm1 = vcmask 5120   ;;  %vm92_vm2 = vcmask 62520   ;;  %vm109_vm3 = vcmask 52232  }
  0x39   :  { %73 = vst.msk [vmem:[#allocation2] sm:$0x1] %vm72_vm0, %v1712_v3  ;;  %79 = vst.msk [vmem:[#allocation2 + $0x5] sm:$0x1] %vm72_vm0, %v1712_v3  ;;  %v1470_v4 = vld [vmem:[%s2702_s0 + $0x10] sm:$0xf] }
  0x3a   :  { %74 = vst.msk [vmem:[#allocation2 + $0x8] sm:$0x1] %vm72_vm0, %v1712_v3  ;;  %75 = vst.msk [vmem:[#allocation2 + $0x10] sm:$0x1] %vm72_vm0, %v1712_v3  ;;  %v1471_v5 = vld [vmem:[%s2702_s0 + $0x8] sm:$0xf] }
  0x3b   :  { %76 = vst.msk [vmem:[#allocation2 + $0x18] sm:$0x1] %vm72_vm0, %v1712_v3  ;;  %77 = vst.msk [vmem:[#allocation2 + $0x20] sm:$0x1] %vm72_vm0, %v1712_v3  ;;  %v1472_v6 = vld [vmem:[%s2702_s0 + $0x14] sm:$0xf] }
  0x3c   :  { %78 = vst.msk [vmem:[#allocation2 + $0x28] sm:$0x1] %vm72_vm0, %v1712_v3  ;;  %80 = vst.msk [vmem:[#allocation2 + $0xd] sm:$0x1] %vm72_vm0, %v1712_v3  ;;  %105 = vrot.lane.b32.xlu0 %v100_v2, %s1711_s15  ;;  %119 = vrot.lane.b32.xlu1 %v1470_v4, %s1711_s15  ;;  %s1477_s26 = sld [smem:[#allocation3 + $0x1]]  ;;  %s1478_s27 = sld [smem:[#allocation3 + $0x1c]] }
  0x3d   :  { %81 = vst.msk [vmem:[#allocation2 + $0x15] sm:$0x1] %vm72_vm0, %v1712_v3  ;;  %82 = vst.msk [vmem:[#allocation2 + $0x1d] sm:$0x1] %vm72_vm0, %v1712_v3  ;;  %s1479_s28 = sld [smem:[#allocation3 + $0x37]]  ;;  %s1480_s29 = sld [smem:[#allocation3 + $0x2]] }
  0x3e   :  { %83 = vst.msk [vmem:[#allocation2 + $0x25] sm:$0x1] %vm72_vm0, %v1712_v3  ;;  %84 = vst.msk [vmem:[#allocation2 + $0x2d] sm:$0x1] %vm72_vm0, %v1712_v3  ;;  %s1713_s2 = smov 127   ;;  %s1481_s1 = sld [smem:[#allocation3 + $0x1d]] }
  0x3f   :  { %86 = vst.msk [vmem:[#allocation2] sm:$0x3f] %vm85_vm1, %v1712_v3  ;;  %89 = vst.msk [vmem:[#allocation2 + $0x18] sm:$0x3f] %vm85_vm1, %v1712_v3  ;;  %s1482_s30 = sld [smem:[#allocation3 + $0x38]]  ;;  %s1486_s7 = sld [smem:[#allocation3 + $0x4]] }
  0x40   :  { %87 = vst.msk [vmem:[#allocation2 + $0x8] sm:$0x3f] %vm85_vm1, %v1712_v3  ;;  %88 = vst.msk [vmem:[#allocation2 + $0x10] sm:$0x3f] %vm85_vm1, %v1712_v3  ;;  %131 = vrot.lane.b32.xlu0 %v1471_v5, %s1711_s15  ;;  %133 = vrot.lane.b32.xlu1 %v1472_v6, %s1711_s15  ;;  %s1714_s8 = smov 126   ;;  %s1487_s9 = sld [smem:[#allocation3 + $0x1f]] }
  0x41   :  { %90 = vst.msk [vmem:[#allocation2 + $0x20] sm:$0x3f] %vm85_vm1, %v1712_v3  ;;  %91 = vst.msk [vmem:[#allocation2 + $0x28] sm:$0x3f] %vm85_vm1, %v1712_v3  ;;  %s1488_s10 = sld [smem:[#allocation3 + $0x3a]]  ;;  %s1489_s11 = sld [smem:[#allocation3 + $0x5]] }
  0x42   :  { %93 = vst.msk [vmem:[#allocation2] sm:$0x3f] %vm92_vm2, %v1712_v3  ;;  %96 = vst.msk [vmem:[#allocation2 + $0x18] sm:$0x3f] %vm92_vm2, %v1712_v3  ;;  %v167_v11 = vstv %s1477_s26  ;;  %v181_v16 = vstv %s1478_s27  ;;  %s1490_s12 = sld [smem:[#allocation3 + $0x20]]  ;;  %s1491_s13 = sld [smem:[#allocation3 + $0x3b]] }
  0x43   :  { %94 = vst.msk [vmem:[#allocation2 + $0x8] sm:$0x3f] %vm92_vm2, %v1712_v3  ;;  %95 = vst.msk [vmem:[#allocation2 + $0x10] sm:$0x3f] %vm92_vm2, %v1712_v3  ;;  %v195_v20 = vstv %s1479_s28  ;;  %v209_v23 = vstv %s1480_s29  ;;  %s1495_s3 = sld [smem:[#allocation3 + $0x7]]  ;;  %s1496_s4 = sld [smem:[#allocation3 + $0x22]] }
  0x44   :  { %97 = vst.msk [vmem:[#allocation2 + $0x20] sm:$0x3f] %vm92_vm2, %v1712_v3  ;;  %98 = vst.msk [vmem:[#allocation2 + $0x28] sm:$0x3f] %vm92_vm2, %v1712_v3  ;;  %v223_v26 = vstv %s1481_s1  ;;  %s1497_s14 = sld [smem:[#allocation3 + $0x3d]]  ;;  %s1498_s15 = sld [smem:[#allocation3 + $0x8]] }
  0x45   :  { %v237_v29 = vstv %s1482_s30  ;;  %v271_v33 = vstv %s1486_s7  ;;  %s1499_s16 = sld [smem:[#allocation3 + $0x23]]  ;;  %s1500_s17 = sld [smem:[#allocation3 + $0x3e]]  ;;  %vm1082_vm4 = vcmask 44032   ;;  %vm1267_vm5 = vcmask 19456  }
  0x46   :  { %v285_v37 = vstv %s1487_s9  ;;  %s1504_s18 = sld [smem:[#allocation3 + $0xa]]  ;;  %s1505_s19 = sld [smem:[#allocation3 + $0x25]]  ;;  %vm1276_vm6 = vcmask 93256  }
  0x47   :  { %v299_v40 = vstv %s1488_s10  ;;  %v313_v43 = vstv %s1489_s11  ;;  %s1506_s20 = sld [smem:[#allocation3 + $0x40]]  ;;  %s1507_s21 = sld [smem:[#allocation3 + $0xb]] }
  0x48   :  { %v327_v46 = vstv %s1490_s12  ;;  %v341_v49 = vstv %s1491_s13  ;;  %s1508_s22 = sld [smem:[#allocation3 + $0x26]]  ;;  %s1509_s23 = sld [smem:[#allocation3 + $0x41]] }
  0x49   :  { %v375_v53 = vstv %s1495_s3  ;;  %v389_v57 = vstv %s1496_s4  ;;  %s1513_s24 = sld [smem:[#allocation3 + $0xd]]  ;;  %s1514_s25 = sld [smem:[#allocation3 + $0x28]] }
  0x4a   :  { %v403_v60 = vstv %s1497_s14  ;;  %v417_v63 = vstv %s1498_s15  ;;  %s1515_s26 = sld [smem:[#allocation3 + $0x43]]  ;;  %s1516_s27 = sld [smem:[#allocation3 + $0xe]] }
  0x4b   :  { %v431_v2 = vstv %s1499_s16  ;;  %v445_v5 = vstv %s1500_s17  ;;  %s1517_s28 = sld [smem:[#allocation3 + $0x29]]  ;;  %s1948_s29 = sld [smem:[#allocation3 + $0x44]] }
  0x4c   :  { %s1954_s1 = sld [smem:[#allocation3 + $0x10]]  ;;  %s1963_s7 = sld [smem:[#allocation3 + $0x2b]] }
  0x4d   :  { %s1958_s30 = sld [smem:[#allocation3]]  ;;  %s1969_s10 = sld [smem:[#allocation3 + $0x1b]] }
  0x4e   :  { %s1967_s9 = sld [smem:[#allocation6]]  ;;  %s1973_s11 = sld [smem:[#allocation3 + $0x36]] }
  0x4f   :  { %s1978_s12 = sld [smem:[#allocation3 + $0x11]]  ;;  %s1985_s3 = sld [smem:[#allocation3 + $0x3]] }
  0x50   :  { %s1983_s13 = sld [smem:[#allocation6 + $0x1]]  ;;  %s1987_s4 = sld [smem:[#allocation6 + $0x2]] }
  0x51   :  { %s1991_s14 = sld [smem:[#allocation3 + $0x46]]  ;;  %s2001_s15 = sld [smem:[#allocation3 + $0x2c]] }
  0x52   :  { %s2003_s16 = sld [smem:[#allocation3 + $0x1e]]  ;;  %s2015_s17 = sld [smem:[#allocation3 + $0x39]] }
  0x53   :  { %s2440_s5 = sld [smem:[#allocation8 + $0x1a]] }
  0xaa   :  { %v104_v7 = vpop.permute.xlu0 %103  ;;  %v118_v8 = vpop.permute.xlu1 %117 }
  0xab   :  { %110 = vst.msk [vmem:[#allocation2 + $0x1] sm:$0xf] %vm109_vm3, %v104_v7  ;;  %124 = vst.msk [vmem:[#allocation2 + $0x9] sm:$0xf] %vm109_vm3, %v118_v8  ;;  %v479_v7 = vstv %s1504_s18  ;;  %s2023_s18 = sld [smem:[#allocation3 + $0x47]] }
  0xae   :  { %v106_v9 = vpop.permute.xlu0 %105  ;;  %v120_v10 = vpop.permute.xlu1 %119 }
  0xaf   :  { %111 = vst.msk [vmem:[#allocation2 + $0x19] sm:$0xf] %vm109_vm3, %v106_v9  ;;  %125 = vst.msk [vmem:[#allocation2 + $0x21] sm:$0xf] %vm109_vm3, %v120_v10 }
  0xb2   :  { %v1822_v12 = vld [vmem:[#allocation2] sm:$0xf]  ;;  %v132_v13 = vpop.permute.xlu0 %131  ;;  %v134_v15 = vpop.permute.xlu1 %133  ;;  %v1902_v6 = vld [vmem:[#allocation2 + $0x8] sm:$0xf] }
  0xb3   :  { %v168_v14 = vmul.f32 %v167_v11, %v1822_v12  ;;  %138 = vst.msk [vmem:[#allocation2 + $0x11] sm:$0xf] %vm109_vm3, %v132_v13  ;;  %139 = vst.msk [vmem:[#allocation2 + $0x29] sm:$0xf] %vm109_vm3, %v134_v15  ;;  %v182_v19 = vmul.f32 %v181_v16, %v1822_v12  ;;  %v196_v22 = vmul.f32 %v195_v20, %v1822_v12  ;;  %v1848_v32 = vld [vmem:[#allocation2 + $0x1] sm:$0xf] }
  0xb4   :  { %v210_v25 = vmul.f32 %v209_v23, %v1822_v12  ;;  %v224_v28 = vmul.f32 %v223_v26, %v1822_v12  ;;  %v238_v31 = vmul.f32 %v237_v29, %v1822_v12  ;;  %v272_v35 = vmul.f32 %v271_v33, %v1848_v32  ;;  %v1876_v52 = vld [vmem:[#allocation2 + $0x2] sm:$0xf] }
  0xb5   :  { %172 = vrot.lane.b32.xlu0 %v168_v14, %s1713_s2  ;;  %v286_v39 = vmul.f32 %v285_v37, %v1848_v32  ;;  %v300_v42 = vmul.f32 %v299_v40, %v1848_v32  ;;  %v314_v45 = vmul.f32 %v313_v43, %v1848_v32  ;;  %v328_v48 = vmul.f32 %v327_v46, %v1848_v32 }
  0xb6   :  { %v1828_v17 = vld [vmem:[#allocation2 + $0x18] sm:$0xf]  ;;  %v342_v51 = vmul.f32 %v341_v49, %v1848_v32  ;;  %v376_v55 = vmul.f32 %v375_v53, %v1876_v52  ;;  %v390_v59 = vmul.f32 %v389_v57, %v1876_v52  ;;  %v404_v62 = vmul.f32 %v403_v60, %v1876_v52 }
  0xb7   :  { %v169_v18 = vmul.f32 %v167_v11, %v1828_v17  ;;  %v183_v21 = vmul.f32 %v181_v16, %v1828_v17  ;;  %v197_v24 = vmul.f32 %v195_v20, %v1828_v17  ;;  %v211_v27 = vmul.f32 %v209_v23, %v1828_v17  ;;  %v1854_v36 = vld [vmem:[#allocation2 + $0x19] sm:$0xf]  ;;  %v1909_v11 = vld [vmem:[#allocation2 + $0x20] sm:$0xf] }
  0xb8   :  { %v225_v30 = vmul.f32 %v223_v26, %v1828_v17  ;;  %v239_v34 = vmul.f32 %v237_v29, %v1828_v17  ;;  %v273_v38 = vmul.f32 %v271_v33, %v1854_v36  ;;  %v287_v41 = vmul.f32 %v285_v37, %v1854_v36  ;;  %v1882_v56 = vld [vmem:[#allocation2 + $0x1a] sm:$0xf] }
  0xb9   :  { %174 = vrot.lane.b32.xlu1 %v169_v18, %s1713_s2  ;;  %186 = vrot.lane.b32.xlu0 %v182_v19, %s1713_s2  ;;  %v301_v44 = vmul.f32 %v299_v40, %v1854_v36  ;;  %v315_v47 = vmul.f32 %v313_v43, %v1854_v36  ;;  %v329_v50 = vmul.f32 %v327_v46, %v1854_v36  ;;  %v493_v14 = vstv %s1505_s19  ;;  %s2037_s19 = sld [smem:[#allocation3 + $0x13]] }
  0xba   :  { %v343_v54 = vmul.f32 %v341_v49, %v1854_v36  ;;  %v377_v58 = vmul.f32 %v375_v53, %v1882_v56  ;;  %v391_v61 = vmul.f32 %v389_v57, %v1882_v56  ;;  %v405_v0 = vmul.f32 %v403_v60, %v1882_v56 }
  0xbb   :  { %v418_v1 = vmul.f32 %v417_v63, %v1876_v52  ;;  %v419_v3 = vmul.f32 %v417_v63, %v1882_v56  ;;  %v432_v4 = vmul.f32 %v431_v2, %v1876_v52  ;;  %v433_v8 = vmul.f32 %v431_v2, %v1882_v56  ;;  %v1994_v63 = vld [vmem:[#allocation2 + $0x22] sm:$0xf] }
  0xbc   :  { %v446_v9 = vmul.f32 %v445_v5, %v1876_v52  ;;  %v480_v10 = vmul.f32 %v479_v7, %v1902_v6  ;;  %v447_v13 = vmul.f32 %v445_v5, %v1882_v56  ;;  %v481_v15 = vmul.f32 %v479_v7, %v1909_v11 }
  0xbd   :  { %188 = vrot.lane.b32.xlu1 %v183_v21, %s1713_s2  ;;  %200 = vrot.lane.b32.xlu0 %v196_v22, %s1713_s2  ;;  %v494_v16 = vmul.f32 %v493_v14, %v1902_v6  ;;  %v507_v18 = vstv %s1506_s20  ;;  %v495_v19 = vmul.f32 %v493_v14, %v1909_v11  ;;  %v521_v21 = vstv %s1507_s21  ;;  %s2051_s20 = sld [smem:[#allocation3 + $0x2e]]  ;;  %s2065_s21 = sld [smem:[#allocation3 + $0x14]] }
  0xbe   :  { %v508_v20 = vmul.f32 %v507_v18, %v1902_v6  ;;  %v509_v22 = vmul.f32 %v507_v18, %v1909_v11  ;;  %v522_v23 = vmul.f32 %v521_v21, %v1902_v6  ;;  %v597_v37 = vstv %s1514_s25  ;;  %s2086_s25 = sld [smem:[#allocation3 + $0x2f]] }
  0xbf   :  { %v611_v40 = vstv %s1515_s26  ;;  %v625_v43 = vstv %s1516_s27  ;;  %v639_v46 = vstv %s1517_s28  ;;  %v653_v49 = vstv %s1948_s29  ;;  %s2092_s26 = sld [smem:[#allocation3 + $0x3c]]  ;;  %s2097_s27 = sld [smem:[#allocation3 + $0x4a]] }
  0xc0   :  { %v149_v57 = vstv %s1958_s30  ;;  %v155_v2 = vstv %s1969_s10  ;;  %v729_v14 = vstv %s1978_s12  ;;  %s2113_s28 = sld [smem:[#allocation3 + $0x16]]  ;;  %s2125_s29 = sld [smem:[#allocation3 + $0x31]] }
  0xc1   :  { %202 = vrot.lane.b32.xlu1 %v197_v24, %s1713_s2  ;;  %214 = vrot.lane.b32.xlu0 %v210_v25, %s1714_s8  ;;  %v535_v24 = vstv %s1508_s22  ;;  %v523_v25 = vmul.f32 %v521_v21, %v1909_v11  ;;  %s2069_s22 = sld [smem:[#allocation3 + $0x6]]  ;;  %s2144_s30 = sld [smem:[#allocation3 + $0x9]] }
  0xc2   :  { %v536_v26 = vmul.f32 %v535_v24, %v1902_v6  ;;  %s2161_s10 = sld [smem:[#allocation3 + $0x32]]  ;;  %s2172_s12 = sld [smem:[#allocation3 + $0x4d]] }
  0xc5   :  { %216 = vrot.lane.b32.xlu1 %v211_v27, %s1714_s8  ;;  %228 = vrot.lane.b32.xlu0 %v224_v28, %s1714_s8  ;;  %v549_v27 = vstv %s1509_s23  ;;  %v537_v28 = vmul.f32 %v535_v24, %v1909_v11  ;;  %s2078_s23 = sld [smem:[#allocation3 + $0x49]] }
  0xc6   :  { %v550_v29 = vmul.f32 %v549_v27, %v1902_v6  ;;  %v551_v33 = vmul.f32 %v549_v27, %v1909_v11 }
  0xc9   :  { %230 = vrot.lane.b32.xlu1 %v225_v30, %s1714_s8  ;;  %242 = vrot.lane.b32.xlu0 %v238_v31, %s1714_s8  ;;  %v1932_v30 = vld [vmem:[#allocation2 + $0x9] sm:$0xf]  ;;  %v583_v31 = vstv %s1513_s24  ;;  %s2082_s24 = sld [smem:[#allocation3 + $0x21]] }
  0xca   :  { %v654_v53 = vmul.f32 %v653_v49, %v1932_v30 }
  0xcd   :  { %244 = vrot.lane.b32.xlu1 %v239_v34, %s1714_s8  ;;  %276 = vrot.lane.b32.xlu0 %v272_v35, %s1713_s2  ;;  %v584_v34 = vmul.f32 %v583_v31, %v1932_v30  ;;  %v1938_v35 = vld [vmem:[#allocation2 + $0x21] sm:$0xf] }
  0xce   :  { %v655_v60 = vmul.f32 %v653_v49, %v1938_v35 }
  0xd1   :  { %278 = vrot.lane.b32.xlu1 %v273_v38, %s1713_s2  ;;  %290 = vrot.lane.b32.xlu0 %v286_v39, %s1713_s2  ;;  %v585_v38 = vmul.f32 %v583_v31, %v1938_v35  ;;  %v598_v39 = vmul.f32 %v597_v37, %v1932_v30 }
  0xd5   :  { %292 = vrot.lane.b32.xlu1 %v287_v41, %s1713_s2  ;;  %304 = vrot.lane.b32.xlu0 %v300_v42, %s1713_s2  ;;  %v599_v41 = vmul.f32 %v597_v37, %v1938_v35  ;;  %v612_v42 = vmul.f32 %v611_v40, %v1932_v30 }
  0xd9   :  { %306 = vrot.lane.b32.xlu1 %v301_v44, %s1713_s2  ;;  %318 = vrot.lane.b32.xlu0 %v314_v45, %s1714_s8  ;;  %v626_v44 = vmul.f32 %v625_v43, %v1932_v30  ;;  %v627_v45 = vmul.f32 %v625_v43, %v1938_v35 }
  0xdd   :  { %320 = vrot.lane.b32.xlu1 %v315_v47, %s1714_s8  ;;  %332 = vrot.lane.b32.xlu0 %v328_v48, %s1714_s8  ;;  %v613_v47 = vmul.f32 %v611_v40, %v1938_v35  ;;  %v640_v48 = vmul.f32 %v639_v46, %v1932_v30 }
  0xe1   :  { %334 = vrot.lane.b32.xlu1 %v329_v50, %s1714_s8  ;;  %346 = vrot.lane.b32.xlu0 %v342_v51, %s1714_s8  ;;  %v641_v51 = vmul.f32 %v639_v46, %v1938_v35 }
  0xe5   :  { %348 = vrot.lane.b32.xlu1 %v343_v54, %s1714_s8  ;;  %380 = vrot.lane.b32.xlu0 %v376_v55, %s1713_s2  ;;  %v1975_v54 = vld [vmem:[#allocation2 + $0xa] sm:$0xf]  ;;  %v687_v55 = vstv %s1954_s1  ;;  %s2140_s1 = sld [smem:[#allocation3 + $0x17]] }
  0xe6   :  { %v689_v7 = vmul.f32 %v687_v55, %v1994_v63 }
  0xe9   :  { %382 = vrot.lane.b32.xlu1 %v377_v58, %s1713_s2  ;;  %394 = vrot.lane.b32.xlu0 %v390_v59, %s1713_s2 }
  0xed   :  { %396 = vrot.lane.b32.xlu1 %v391_v61, %s1713_s2  ;;  %408 = vrot.lane.b32.xlu0 %v404_v62, %s1713_s2  ;;  %v688_v61 = vmul.f32 %v687_v55, %v1975_v54  ;;  %v150_v62 = vmul.f32 %v149_v57, %v1822_v12 }
  0xf1   :  { %410 = vrot.lane.b32.xlu1 %v405_v0, %s1713_s2  ;;  %422 = vrot.lane.b32.xlu0 %v418_v1, %s1714_s8  ;;  %v701_v0 = vstv %s1963_s7  ;;  %v141_v1 = vstv %s1967_s9  ;;  %s2153_s7 = sld [smem:[#allocation3 + $0x4c]] }
  0xf2   :  { %v703_v24 = vmul.f32 %v701_v0, %v1994_v63  ;;  %s2157_s9 = sld [smem:[#allocation3 + $0x24]] }
  0xf5   :  { %424 = vrot.lane.b32.xlu1 %v419_v3, %s1714_s8  ;;  %436 = vrot.lane.b32.xlu0 %v432_v4, %s1714_s8  ;;  %v161_v4 = vstv %s1973_s11  ;;  %s2167_s11 = sld [smem:[#allocation3 + $0x3f]] }
  0xf6   :  { %v162_v21 = vmul.f32 %v161_v4, %v1822_v12 }
  0xf9   :  { %438 = vrot.lane.b32.xlu1 %v433_v8, %s1714_s8  ;;  %450 = vrot.lane.b32.xlu0 %v446_v9, %s1714_s8  ;;  %v702_v8 = vmul.f32 %v701_v0, %v1975_v54  ;;  %v152_v9 = vadd.f32 %v150_v62, %v141_v1  ;;  %v757_v62 = vstv %s2023_s18  ;;  %s2240_s18 = sld [smem:[#allocation3 + $0x42]] }
  0xfd   :  { %452 = vrot.lane.b32.xlu1 %v447_v13, %s1714_s8  ;;  %484 = vrot.lane.b32.xlu0 %v480_v10, %s1713_s2  ;;  %v151_v10 = vmul.f32 %v149_v57, %v1828_v17  ;;  %v156_v13 = vmul.f32 %v155_v2, %v1822_v12  ;;  %v259_v12 = vstv %s2003_s16  ;;  %s2230_s16 = sld [smem:[#allocation3 + $0x27]] }
  0xfe   :  { %v260_v49 = vmul.f32 %v259_v12, %v1848_v32 }
  0xff   :  { %v153_v27 = vadd.f32 %v151_v10, %v141_v1 }
 0x101   :  { %486 = vrot.lane.b32.xlu1 %v481_v15, %s1713_s2  ;;  %498 = vrot.lane.b32.xlu0 %v494_v16, %s1713_s2  ;;  %v143_v15 = vstv %s1983_s13  ;;  %v253_v16 = vstv %s1985_s3  ;;  %s2186_s13 = sld [smem:[#allocation3 + $0x19]]  ;;  %s2202_s3 = sld [smem:[#allocation3 + $0x34]] }
 0x102   :  { %v254_v31 = vmul.f32 %v253_v16, %v1848_v32 }
 0x105   :  { %500 = vrot.lane.b32.xlu1 %v495_v19, %s1713_s2  ;;  %512 = vrot.lane.b32.xlu0 %v508_v20, %s1713_s2  ;;  %v157_v19 = vmul.f32 %v155_v2, %v1828_v17  ;;  %v145_v20 = vstv %s1987_s4  ;;  %v261_v2 = vmul.f32 %v259_v12, %v1854_v36  ;;  %s2215_s4 = sld [smem:[#allocation3 + $0x1a]] }
 0x106   :  { %v164_v40 = vadd.f32 %v162_v21, %v145_v20  ;;  %v759_v21 = vmul.f32 %v757_v62, %v1994_v63 }
 0x109   :  { %514 = vrot.lane.b32.xlu1 %v509_v22, %s1713_s2  ;;  %526 = vrot.lane.b32.xlu0 %v522_v23, %s1714_s8 }
 0x10d   :  { %528 = vrot.lane.b32.xlu1 %v523_v25, %s1714_s8  ;;  %540 = vrot.lane.b32.xlu0 %v536_v26, %s1714_s8  ;;  %v730_v25 = vmul.f32 %v729_v14, %v1975_v54  ;;  %v715_v26 = vstv %s1991_s14  ;;  %s2219_s14 = sld [smem:[#allocation3 + $0xc]] }
 0x111   :  { %542 = vrot.lane.b32.xlu1 %v537_v28, %s1714_s8  ;;  %554 = vrot.lane.b32.xlu0 %v550_v29, %s1714_s8  ;;  %v158_v28 = vadd.f32 %v156_v13, %v143_v15  ;;  %v758_v13 = vmul.f32 %v757_v62, %v1975_v54 }
 0x115   :  { %556 = vrot.lane.b32.xlu1 %v551_v33, %s1714_s8  ;;  %588 = vrot.lane.b32.xlu0 %v584_v34, %s1713_s2  ;;  %v743_v33 = vstv %s2001_s15  ;;  %s2226_s15 = sld [smem:[#allocation3 + $0x4f]] }
 0x116   :  { %v745_v10 = vmul.f32 %v743_v33, %v1994_v63 }
 0x119   :  { %590 = vrot.lane.b32.xlu1 %v585_v38, %s1713_s2  ;;  %602 = vrot.lane.b32.xlu0 %v598_v39, %s1713_s2  ;;  %v159_v38 = vadd.f32 %v157_v19, %v143_v15  ;;  %v791_v15 = vstv %s2037_s19  ;;  %s2245_s19 = sld [smem:[#allocation3 + $0x50]] }
 0x11d   :  { %604 = vrot.lane.b32.xlu1 %v599_v41, %s1713_s2  ;;  %616 = vrot.lane.b32.xlu0 %v612_v42, %s1713_s2  ;;  %v163_v41 = vmul.f32 %v161_v4, %v1828_v17  ;;  %v265_v17 = vstv %s2015_s17  ;;  %s2234_s17 = sld [smem:[#allocation3 + $0x35]] }
 0x11f   :  { %v165_v57 = vadd.f32 %v163_v41, %v145_v20 }
 0x121   :  { %630 = vrot.lane.b32.xlu1 %v626_v44, %s1714_s8  ;;  %632 = vrot.lane.b32.xlu0 %v627_v45, %s1714_s8  ;;  %v731_v44 = vmul.f32 %v729_v14, %v1994_v63  ;;  %v716_v45 = vmul.f32 %v715_v26, %v1975_v54 }
 0x125   :  { %618 = vrot.lane.b32.xlu1 %v613_v47, %s1713_s2  ;;  %644 = vrot.lane.b32.xlu0 %v640_v48, %s1714_s8  ;;  %v255_v48 = vmul.f32 %v253_v16, %v1854_v36  ;;  %v267_v16 = vmul.f32 %v265_v17, %v1854_v36  ;;  %v805_v36 = vstv %s2051_s20  ;;  %s1519_s20 = sld [smem:[#allocation3 + $0xf]] }
 0x127   :  { %v173_v50 = vpop.permute.xlu0 %172 }
 0x128   :  { %v178_v18 = vadd.f32 %v173_v50, %v152_v9 }
 0x129   :  { %646 = vrot.lane.b32.xlu1 %v641_v51, %s1714_s8  ;;  %658 = vrot.lane.b32.xlu0 %v654_v53, %s1714_s8 }
 0x12b   :  { %v175_v58 = vpop.permute.xlu1 %174  ;;  %v187_v59 = vpop.permute.xlu0 %186 }
 0x12c   :  { %v179_v34 = vadd.f32 %v175_v58, %v153_v27  ;;  %v192_v37 = vadd.f32 %v187_v59, %v158_v28  ;;  %v833_v28 = vstv %s2065_s21  ;;  %s2373_s21 = sld [smem:[#allocation8 + $0x4]] }
 0x12d   :  { %660 = vrot.lane.b32.xlu1 %v655_v60, %s1714_s8  ;;  %692 = vrot.lane.b32.xlu0 %v688_v61, %s1713_s2  ;;  %v717_v60 = vmul.f32 %v715_v26, %v1994_v63  ;;  %v744_v61 = vmul.f32 %v743_v33, %v1975_v54 }
 0x12f   :  { %v189_v3 = vpop.permute.xlu1 %188  ;;  %v201_v5 = vpop.permute.xlu0 %200 }
 0x130   :  { %v193_v50 = vadd.f32 %v189_v3, %v159_v38  ;;  %v206_v51 = vadd.f32 %v201_v5, %v164_v40  ;;  %v266_v3 = vmul.f32 %v265_v17, %v1848_v32  ;;  %v2061_v32 = vld [vmem:[#allocation2 + $0x10] sm:$0xf]  ;;  %v819_v40 = vstv %s2078_s23  ;;  %s1715_s23 = smov 125  }
 0x131   :  { %694 = vrot.lane.b32.xlu1 %v689_v7, %s1713_s2  ;;  %706 = vrot.lane.b32.xlu0 %v702_v8, %s1713_s2  ;;  %v806_v27 = vmul.f32 %v805_v36, %v2061_v32 }
 0x133   :  { %v203_v22 = vpop.permute.xlu1 %202  ;;  %v215_v23 = vpop.permute.xlu0 %214 }
 0x134   :  { %v220_v29 = vadd.f32 %v215_v23, %v178_v18  ;;  %v207_v4 = vadd.f32 %v203_v22, %v165_v57  ;;  %v792_v22 = vmul.f32 %v791_v15, %v2061_v32  ;;  %v2075_v23 = vld [vmem:[#allocation2 + $0x28] sm:$0xf] }
 0x135   :  { %708 = vrot.lane.b32.xlu1 %v703_v24, %s1713_s2  ;;  %734 = vrot.lane.b32.xlu0 %v730_v25, %s1714_s8  ;;  %v793_v26 = vmul.f32 %v791_v15, %v2075_v23 }
 0x136   :  { %v2030_v39 = vadd.f32 %v254_v31, %v220_v29  ;;  %v357_v29 = vstv %s2069_s22  ;;  %s2375_s22 = sld [smem:[#allocation8 + $0x7]] }
 0x137   :  { %v217_v42 = vpop.permute.xlu1 %216  ;;  %v229_v43 = vpop.permute.xlu0 %228  ;;  %v358_v41 = vmul.f32 %v357_v29, %v1876_v52 }
 0x138   :  { %v221_v46 = vadd.f32 %v217_v42, %v179_v34  ;;  %v234_v47 = vadd.f32 %v229_v43, %v192_v37  ;;  %v807_v34 = vmul.f32 %v805_v36, %v2075_v23  ;;  %v834_v37 = vmul.f32 %v833_v28, %v2061_v32 }
 0x139   :  { %736 = vrot.lane.b32.xlu1 %v731_v44, %s1714_s8  ;;  %720 = vrot.lane.b32.xlu0 %v716_v45, %s1713_s2  ;;  %v363_v42 = vstv %s2082_s24  ;;  %s2286_s24 = sld [smem:[#allocation3 + $0x45]] }
 0x13a   :  { %v2042_v53 = vadd.f32 %v255_v48, %v221_v46  ;;  %v2044_v55 = vadd.f32 %v260_v49, %v234_v47  ;;  %v835_v47 = vmul.f32 %v833_v28, %v2075_v23  ;;  %v820_v48 = vmul.f32 %v819_v40, %v2061_v32 }
 0x13b   :  { %v231_v58 = vpop.permute.xlu1 %230  ;;  %v243_v59 = vpop.permute.xlu0 %242  ;;  %v847_v49 = vstv %s2086_s25  ;;  %v364_v57 = vmul.f32 %v363_v42, %v1876_v52  ;;  %s2384_s25 = sld [smem:[#allocation8 + $0x9]] }
 0x13c   :  { %v235_v0 = vadd.f32 %v231_v58, %v193_v50  ;;  %v248_v1 = vadd.f32 %v243_v59, %v206_v51  ;;  %v359_v51 = vmul.f32 %v357_v29, %v1882_v56  ;;  %v849_v15 = vmul.f32 %v847_v49, %v2075_v23 }
 0x13d   :  { %722 = vrot.lane.b32.xlu1 %v717_v60, %s1713_s2  ;;  %748 = vrot.lane.b32.xlu0 %v744_v61, %s1714_s8 }
 0x13e   :  { %v2055_v5 = vadd.f32 %v261_v2, %v235_v0  ;;  %v2057_v7 = vadd.f32 %v266_v3, %v248_v1  ;;  %v821_v0 = vmul.f32 %v819_v40, %v2075_v23  ;;  %v848_v1 = vmul.f32 %v847_v49, %v2061_v32 }
 0x13f   :  { %v245_v8 = vpop.permute.xlu1 %244  ;;  %v277_v9 = vpop.permute.xlu0 %276  ;;  %v861_v2 = vstv %s2097_s27  ;;  %s2389_s27 = sld [smem:[#allocation8 + $0x10]] }
 0x140   :  { %v249_v14 = vadd.f32 %v245_v8, %v207_v4  ;;  %v282_v31 = vadd.f32 %v277_v9, %v2030_v39  ;;  %v365_v8 = vmul.f32 %v363_v42, %v1882_v56 }
 0x141   :  { %750 = vrot.lane.b32.xlu1 %v745_v10, %s1714_s8  ;;  %762 = vrot.lane.b32.xlu0 %v758_v13, %s1714_s8 }
 0x142   :  { %v2071_v18 = vadd.f32 %v267_v16, %v249_v14  ;;  %v862_v16 = vmul.f32 %v861_v2, %v2061_v32 }
 0x143   :  { %v279_v19 = vpop.permute.xlu1 %278  ;;  %v291_v20 = vpop.permute.xlu0 %290 }
 0x144   :  { %v283_v39 = vadd.f32 %v279_v19, %v2042_v53  ;;  %v296_v43 = vadd.f32 %v291_v20, %v2044_v55  ;;  %v369_v53 = vstv %s2092_s26  ;;  %v2136_v19 = vld [vmem:[#allocation2 + $0x11] sm:$0xf]  ;;  %v895_v20 = vstv %s2113_s28  ;;  %s2387_s26 = sld [smem:[#allocation8 + $0xd]]  ;;  %s2393_s28 = sld [smem:[#allocation9 + $0x2]] }
 0x145   :  { %764 = vrot.lane.b32.xlu1 %v759_v21, %s1714_s8  ;;  %796 = vrot.lane.b32.xlu0 %v792_v22, %s1713_s2  ;;  %v370_v9 = vmul.f32 %v369_v53, %v1876_v52  ;;  %v371_v21 = vmul.f32 %v369_v53, %v1882_v56  ;;  %v909_v56 = vstv %s2125_s29  ;;  %s2395_s29 = sld [smem:[#allocation8 + $0x12]] }
 0x147   :  { %v293_v24 = vpop.permute.xlu1 %292  ;;  %v305_v25 = vpop.permute.xlu0 %304 }
 0x148   :  { %v297_v55 = vadd.f32 %v293_v24, %v2055_v5  ;;  %v310_v58 = vadd.f32 %v305_v25, %v2057_v7  ;;  %v863_v24 = vmul.f32 %v861_v2, %v2075_v23  ;;  %v896_v25 = vmul.f32 %v895_v20, %v2136_v19 }
 0x149   :  { %798 = vrot.lane.b32.xlu1 %v793_v26, %s1713_s2  ;;  %810 = vrot.lane.b32.xlu0 %v806_v27, %s1713_s2  ;;  %v2150_v26 = vld [vmem:[#allocation2 + $0x29] sm:$0xf] }
 0x14a   :  { %v897_v29 = vmul.f32 %v895_v20, %v2150_v26  ;;  %v911_v40 = vmul.f32 %v909_v56, %v2150_v26 }
 0x14b   :  { %v307_v33 = vpop.permute.xlu1 %306  ;;  %v319_v12 = vpop.permute.xlu0 %318 }
 0x14c   :  { %v324_v38 = vadd.f32 %v319_v12, %v282_v31  ;;  %v311_v5 = vadd.f32 %v307_v33, %v2071_v18  ;;  %v910_v31 = vmul.f32 %v909_v56, %v2136_v19  ;;  %v937_v33 = vstv %s2140_s1  ;;  %s2397_s1 = sld [smem:[#allocation8 + $0x2]] }
 0x14d   :  { %812 = vrot.lane.b32.xlu1 %v807_v34, %s1713_s2  ;;  %838 = vrot.lane.b32.xlu0 %v834_v37, %s1714_s8  ;;  %v461_v12 = vstv %s2144_s30  ;;  %s2399_s30 = sld [smem:[#allocation8 + $0xb]] }
 0x14e   :  { %v2106_v44 = vadd.f32 %v358_v41, %v324_v38  ;;  %v938_v41 = vmul.f32 %v937_v33, %v2136_v19 }
 0x14f   :  { %v321_v45 = vpop.permute.xlu1 %320  ;;  %v333_v46 = vpop.permute.xlu0 %332 }
 0x150   :  { %v325_v17 = vadd.f32 %v321_v45, %v283_v39  ;;  %v338_v50 = vadd.f32 %v333_v46, %v296_v43  ;;  %v923_v39 = vstv %s2153_s7  ;;  %v462_v43 = vmul.f32 %v461_v12, %v1902_v6  ;;  %s2403_s7 = sld [smem:[#allocation8 + $0x16]] }
 0x151   :  { %840 = vrot.lane.b32.xlu1 %v835_v47, %s1714_s8  ;;  %824 = vrot.lane.b32.xlu0 %v820_v48, %s1713_s2  ;;  %v467_v45 = vstv %s2157_s9  ;;  %s2405_s9 = sld [smem:[#allocation8 + $0x14]] }
 0x152   :  { %v361_v59 = vadd.f32 %v359_v51, %v325_v17  ;;  %v366_v60 = vadd.f32 %v364_v57, %v338_v50  ;;  %v939_v17 = vmul.f32 %v937_v33, %v2150_v26  ;;  %v924_v50 = vmul.f32 %v923_v39, %v2136_v19 }
 0x153   :  { %v335_v61 = vpop.permute.xlu1 %334  ;;  %v347_v62 = vpop.permute.xlu0 %346  ;;  %v951_v51 = vstv %s2161_s10  ;;  %s1716_s10 = smov 6  }
 0x154   :  { %v339_v3 = vadd.f32 %v335_v61, %v297_v55  ;;  %v352_v4 = vadd.f32 %v347_v62, %v310_v58  ;;  %v463_v55 = vmul.f32 %v461_v12, %v1909_v11  ;;  %v468_v58 = vmul.f32 %v467_v45, %v1902_v6 }
 0x155   :  { %826 = vrot.lane.b32.xlu1 %v821_v0, %s1713_s2  ;;  %852 = vrot.lane.b32.xlu0 %v848_v1, %s1714_s8  ;;  %v953_v20 = vmul.f32 %v951_v51, %v2150_v26 }
 0x156   :  { %v2130_v7 = vadd.f32 %v365_v8, %v339_v3  ;;  %v2132_v10 = vadd.f32 %v370_v9, %v352_v4  ;;  %v925_v3 = vmul.f32 %v923_v39, %v2150_v26  ;;  %v952_v4 = vmul.f32 %v951_v51, %v2136_v19 }
 0x157   :  { %v349_v13 = vpop.permute.xlu1 %348  ;;  %v381_v14 = vpop.permute.xlu0 %380  ;;  %v965_v8 = vstv %s2172_s12  ;;  %s1530_s12 = sld [smem:[#allocation3 + $0x48]] }
 0x158   :  { %v353_v52 = vadd.f32 %v349_v13, %v311_v5  ;;  %v386_v34 = vadd.f32 %v381_v14, %v2106_v44  ;;  %v469_v13 = vmul.f32 %v467_v45, %v1909_v11 }
 0x159   :  { %854 = vrot.lane.b32.xlu1 %v849_v15, %s1714_s8  ;;  %866 = vrot.lane.b32.xlu0 %v862_v16, %s1714_s8 }
 0x15a   :  { %v2146_v18 = vadd.f32 %v371_v21, %v353_v52  ;;  %v966_v21 = vmul.f32 %v965_v8, %v2136_v19 }
 0x15b   :  { %v383_v22 = vpop.permute.xlu1 %382  ;;  %v395_v36 = vpop.permute.xlu0 %394 }
 0x15c   :  { %v387_v44 = vadd.f32 %v383_v22, %v361_v59  ;;  %v400_v46 = vadd.f32 %v395_v36, %v366_v60  ;;  %v473_v59 = vstv %s2167_s11  ;;  %v999_v36 = vstv %s2186_s13  ;;  %s1528_s11 = sld [smem:[#allocation3 + $0x12]]  ;;  %s1537_s13 = sld [smem:[#allocation3 + $0x15]] }
 0x15d   :  { %868 = vrot.lane.b32.xlu1 %v863_v24, %s1714_s8  ;;  %900 = vrot.lane.b32.xlu0 %v896_v25, %s1713_s2  ;;  %v475_v24 = vmul.f32 %v473_v59, %v1909_v11  ;;  %v1013_v11 = vstv %s2202_s3  ;;  %s1538_s3 = sld [smem:[#allocation3 + $0x30]] }
 0x15f   :  { %v397_v27 = vpop.permute.xlu1 %396  ;;  %v409_v28 = vpop.permute.xlu0 %408 }
 0x160   :  { %v401_v60 = vadd.f32 %v397_v27, %v2130_v7  ;;  %v414_v61 = vadd.f32 %v409_v28, %v2132_v10  ;;  %v474_v7 = vmul.f32 %v473_v59, %v1902_v6  ;;  %v2211_v6 = vld [vmem:[#allocation2 + $0x12] sm:$0xf]  ;;  %v967_v27 = vmul.f32 %v965_v8, %v2150_v26 }
 0x161   :  { %902 = vrot.lane.b32.xlu1 %v897_v29, %s1713_s2  ;;  %914 = vrot.lane.b32.xlu0 %v910_v31, %s1713_s2  ;;  %v1000_v28 = vmul.f32 %v999_v36, %v2211_v6  ;;  %v2223_v29 = vld [vmem:[#allocation2 + $0x2a] sm:$0xf]  ;;  %v1055_v59 = vstv %s2234_s17  ;;  %s2359_s17 = sld [smem:[#allocation8]] }
 0x162   :  { %v1001_v12 = vmul.f32 %v999_v36, %v2223_v29  ;;  %v1057_v36 = vmul.f32 %v1055_v59, %v2223_v29 }
 0x163   :  { %v411_v37 = vpop.permute.xlu1 %410  ;;  %v423_v38 = vpop.permute.xlu0 %422 }
 0x164   :  { %v428_v42 = vadd.f32 %v423_v38, %v386_v34  ;;  %v415_v10 = vadd.f32 %v411_v37, %v2146_v18  ;;  %v1014_v34 = vmul.f32 %v1013_v11, %v2211_v6  ;;  %v1041_v38 = vstv %s2215_s4  ;;  %s2344_s4 = sld [smem:[#allocation3 + $0x4b]] }
 0x165   :  { %916 = vrot.lane.b32.xlu1 %v911_v40, %s1713_s2  ;;  %942 = vrot.lane.b32.xlu0 %v938_v41, %s1714_s8  ;;  %v565_v40 = vstv %s2219_s14  ;;  %v1042_v45 = vmul.f32 %v1041_v38, %v2211_v6  ;;  %s1546_s14 = sld [smem:[#allocation3 + $0x18]] }
 0x166   :  { %v2179_v47 = vadd.f32 %v462_v43, %v428_v42  ;;  %v1015_v43 = vmul.f32 %v1013_v11, %v2223_v29 }
 0x167   :  { %v425_v48 = vpop.permute.xlu1 %424  ;;  %v437_v49 = vpop.permute.xlu0 %436 }
 0x168   :  { %v429_v57 = vadd.f32 %v425_v48, %v387_v44  ;;  %v442_v53 = vadd.f32 %v437_v49, %v400_v46  ;;  %v1027_v48 = vstv %s2226_s15  ;;  %v566_v49 = vmul.f32 %v565_v40, %v1932_v30  ;;  %s2352_s15 = sld [smem:[#allocation3 + $0x33]] }
 0x169   :  { %944 = vrot.lane.b32.xlu1 %v939_v17, %s1714_s8  ;;  %928 = vrot.lane.b32.xlu0 %v924_v50, %s1713_s2 }
 0x16a   :  { %v2193_v62 = vadd.f32 %v463_v55, %v429_v57  ;;  %v2195_v0 = vadd.f32 %v468_v58, %v442_v53  ;;  %v1043_v55 = vmul.f32 %v1041_v38, %v2223_v29  ;;  %v1028_v58 = vmul.f32 %v1027_v48, %v2211_v6 }
 0x16b   :  { %v439_v1 = vpop.permute.xlu1 %438  ;;  %v451_v2 = vpop.permute.xlu0 %450 }
 0x16c   :  { %v443_v9 = vadd.f32 %v439_v1, %v401_v60  ;;  %v456_v5 = vadd.f32 %v451_v2, %v414_v61  ;;  %v567_v1 = vmul.f32 %v565_v40, %v1938_v35  ;;  %v669_v40 = vstv %s1519_s20  ;;  %s2367_s20 = sld [smem:[#allocation9]] }
 0x16d   :  { %930 = vrot.lane.b32.xlu1 %v925_v3, %s1713_s2  ;;  %956 = vrot.lane.b32.xlu0 %v952_v4, %s1714_s8 }
 0x16e   :  { %v2207_v14 = vadd.f32 %v469_v13, %v443_v9  ;;  %v476_v15 = vadd.f32 %v474_v7, %v456_v5  ;;  %v1029_v5 = vmul.f32 %v1027_v48, %v2223_v29  ;;  %v1056_v13 = vmul.f32 %v1055_v59, %v2211_v6 }
 0x16f   :  { %v453_v16 = vpop.permute.xlu1 %452  ;;  %v485_v52 = vpop.permute.xlu0 %484  ;;  %v1069_v7 = vstv %s2245_s19  ;;  %v671_v48 = vmul.f32 %v669_v40, %v1994_v63  ;;  %s2364_s19 = sld [smem:[#allocation8 + $0x6]] }
 0x170   :  { %v457_v22 = vadd.f32 %v453_v16, %v415_v10  ;;  %v490_v41 = vadd.f32 %v485_v52, %v2179_v47  ;;  %v571_v47 = vstv %s2230_s16  ;;  %v1071_v11 = vmul.f32 %v1069_v7, %v2223_v29  ;;  %s2355_s16 = sld [smem:[#allocation3 + $0x4e]] }
 0x171   :  { %958 = vrot.lane.b32.xlu1 %v953_v20, %s1714_s8  ;;  %970 = vrot.lane.b32.xlu0 %v966_v21, %s1714_s8  ;;  %v572_v2 = vmul.f32 %v571_v47, %v1932_v30  ;;  %v573_v16 = vmul.f32 %v571_v47, %v1938_v35  ;;  %v2308_v47 = vld [vmem:[%s2702_s0 + $0x10] sm:$0xf] }
 0x172   :  { %v477_v18 = vadd.f32 %v475_v24, %v457_v22  ;;  %v1070_v24 = vmul.f32 %v1069_v7, %v2211_v6 }
 0x173   :  { %v487_v25 = vpop.permute.xlu1 %486  ;;  %v499_v56 = vpop.permute.xlu0 %498 }
 0x174   :  { %v491_v17 = vadd.f32 %v487_v25, %v2193_v62  ;;  %v504_v50 = vadd.f32 %v499_v56, %v2195_v0  ;;  %v577_v62 = vstv %s2240_s18  ;;  %s2362_s18 = sld [smem:[#allocation8 + $0x3]] }
 0x175   :  { %972 = vrot.lane.b32.xlu1 %v967_v27, %s1714_s8  ;;  %1004 = vrot.lane.b32.xlu0 %v1000_v28, %s1713_s2  ;;  %v578_v52 = vmul.f32 %v577_v62, %v1932_v30  ;;  %v579_v56 = vmul.f32 %v577_v62, %v1938_v35  ;;  %v2282_v35 = vld [vmem:[%s2702_s0] sm:$0xf] }
 0x177   :  { %v501_v31 = vpop.permute.xlu1 %500  ;;  %v513_v33 = vpop.permute.xlu0 %512 }
 0x178   :  { %v518_v37 = vadd.f32 %v513_v33, %v476_v15  ;;  %v505_v0 = vadd.f32 %v501_v31, %v2207_v14 }
 0x179   :  { %1006 = vrot.lane.b32.xlu1 %v1001_v12, %s1713_s2  ;;  %1018 = vrot.lane.b32.xlu0 %v1014_v34, %s1713_s2 }
 0x17b   :  { %v515_v42 = vpop.permute.xlu1 %514  ;;  %v527_v39 = vpop.permute.xlu0 %526 }
 0x17c   :  { %v519_v44 = vadd.f32 %v515_v42, %v477_v18  ;;  %v532_v46 = vadd.f32 %v527_v39, %v490_v41  ;;  %v2291_v41 = vld [vmem:[%s2702_s0 + $0xc] sm:$0xf]  ;;  %v2298_v42 = vld [vmem:[%s2702_s0 + $0x4] sm:$0xf] }
 0x17d   :  { %1020 = vrot.lane.b32.xlu1 %v1015_v43, %s1713_s2  ;;  %1046 = vrot.lane.b32.xlu0 %v1042_v45, %s1714_s8 }
 0x17e   :  { %v568_v51 = vadd.f32 %v566_v49, %v532_v46  ;;  %v670_v46 = vmul.f32 %v669_v40, %v1975_v54  ;;  %v785_v40 = vstv %s1530_s12  ;;  %s2415_s12 = sld [smem:[#allocation8 + $0x5]] }
 0x17f   :  { %v529_v57 = vpop.permute.xlu1 %528  ;;  %v541_v53 = vpop.permute.xlu0 %540 }
 0x180   :  { %v533_v60 = vadd.f32 %v529_v57, %v491_v17  ;;  %v546_v61 = vadd.f32 %v541_v53, %v504_v50  ;;  %v2315_v17 = vld [vmem:[%s2702_s0 + $0x8] sm:$0xf] }
 0x181   :  { %1048 = vrot.lane.b32.xlu1 %v1043_v55, %s1714_s8  ;;  %1032 = vrot.lane.b32.xlu0 %v1028_v58, %s1713_s2 }
 0x182   :  { %v569_v3 = vadd.f32 %v567_v1, %v533_v60  ;;  %v574_v4 = vadd.f32 %v572_v2, %v546_v61  ;;  %v681_v60 = vstv %s2286_s24  ;;  %v2324_v61 = vld [vmem:[%s2702_s0 + $0x14] sm:$0xf]  ;;  %s1529_s0 = sld [smem:[#allocation3 + $0x2d]]  ;;  %s2379_s24 = sld [smem:[#allocation8 + $0x13]] }
 0x183   :  { %v543_v8 = vpop.permute.xlu1 %542  ;;  %v555_v9 = vpop.permute.xlu0 %554 }
 0x184   :  { %v547_v10 = vadd.f32 %v543_v8, %v505_v0  ;;  %v560_v15 = vadd.f32 %v555_v9, %v518_v37  ;;  %v682_v8 = vmul.f32 %v681_v60, %v1975_v54 }
 0x185   :  { %1034 = vrot.lane.b32.xlu1 %v1029_v5, %s1713_s2  ;;  %1060 = vrot.lane.b32.xlu0 %v1056_v13, %s1714_s8  ;;  %s2277_s2 = sld [smem:[#allocation3 + $0x2a]] }
 0x186   :  { %v575_v14 = vadd.f32 %v573_v16, %v547_v10  ;;  %v580_v20 = vadd.f32 %v578_v52, %v560_v15  ;;  %v683_v15 = vmul.f32 %v681_v60, %v1994_v63  ;;  %v787_v60 = vmul.f32 %v785_v40, %v2075_v23 }
 0x187   :  { %v557_v21 = vpop.permute.xlu1 %556  ;;  %v589_v22 = vpop.permute.xlu0 %588 }
 0x188   :  { %v561_v18 = vadd.f32 %v557_v21, %v519_v44  ;;  %v594_v25 = vadd.f32 %v589_v22, %v568_v51 }
 0x189   :  { %1062 = vrot.lane.b32.xlu1 %v1057_v36, %s1714_s8  ;;  %1074 = vrot.lane.b32.xlu0 %v1070_v24, %s1714_s8 }
 0x18a   :  { %v581_v30 = vadd.f32 %v579_v56, %v561_v18 }
 0x18b   :  { %v591_v27 = vpop.permute.xlu1 %590  ;;  %v603_v28 = vpop.permute.xlu0 %602  ;;  %v675_v49 = vstv %s2277_s2  ;;  %s2369_s2 = sld [smem:[#allocation8 + $0x1]] }
 0x18c   :  { %v595_v31 = vadd.f32 %v591_v27, %v569_v3  ;;  %v608_v33 = vadd.f32 %v603_v28, %v574_v4  ;;  %v676_v59 = vmul.f32 %v675_v49, %v1975_v54  ;;  %v677_v4 = vmul.f32 %v675_v49, %v1994_v63 }
 0x18d   :  { %1076 = vrot.lane.b32.xlu1 %v1071_v11, %s1714_s8  ;;  %1259 = vrot.lane.b32.xlu0 %v2282_v35, %s1715_s23  ;;  %s2382_s8 = sld [smem:[#allocation9 + $0x1]] }
 0x18f   :  { %v605_v12 = vpop.permute.xlu1 %604  ;;  %v617_v34 = vpop.permute.xlu0 %616 }
 0x190   :  { %v609_v37 = vadd.f32 %v605_v12, %v575_v14  ;;  %v622_v38 = vadd.f32 %v617_v34, %v580_v20  ;;  %v773_v20 = vstv %s1528_s11  ;;  %s2409_s11 = sld [smem:[#allocation8 + $0xc]] }
 0x191   :  { %1261 = vrot.lane.b32.xlu1 %v2291_v41, %s1715_s23  ;;  %1320 = vrot.lane.b32.xlu0 %v2298_v42, %s1715_s23  ;;  %v775_v11 = vmul.f32 %v773_v20, %v2075_v23 }
 0x193   :  { %v631_v39 = vpop.permute.xlu1 %630  ;;  %v633_v43 = vpop.permute.xlu0 %632 }
 0x194   :  { %v636_v45 = vadd.f32 %v631_v39, %v594_v25  ;;  %v637_v44 = vadd.f32 %v633_v43, %v595_v31  ;;  %v774_v25 = vmul.f32 %v773_v20, %v2061_v32  ;;  %v779_v31 = vstv %s1529_s0  ;;  %s2413_s0 = sld [smem:[#allocation8 + $0x15]] }
 0x195   :  { %1322 = vrot.lane.b32.xlu1 %v2308_v47, %s1715_s23  ;;  %1377 = vrot.lane.b32.xlu0 %v2315_v17, %s1715_s23  ;;  %v781_v49 = vmul.f32 %v779_v31, %v2075_v23 }
 0x196   :  { %v672_v50 = vadd.f32 %v670_v46, %v636_v45  ;;  %v673_v51 = vadd.f32 %v671_v48, %v637_v44 }
 0x197   :  { %v619_v57 = vpop.permute.xlu1 %618  ;;  %v645_v53 = vpop.permute.xlu0 %644 }
 0x198   :  { %v623_v55 = vadd.f32 %v619_v57, %v581_v30  ;;  %v650_v58 = vadd.f32 %v645_v53, %v608_v33 }
 0x199   :  { %1379 = vrot.lane.b32.xlu1 %v2324_v61, %s1715_s23  ;;  %1270 = vrot.lane.b32.xlu0 %v2282_v35, %s1716_s10  ;;  %s2377_s23 = sld [smem:[#allocation8 + $0xa]] }
 0x19a   :  { %v678_v1 = vadd.f32 %v676_v59, %v650_v58 }
 0x19b   :  { %v647_v2 = vpop.permute.xlu1 %646  ;;  %v659_v62 = vpop.permute.xlu0 %658 }
 0x19c   :  { %v651_v0 = vadd.f32 %v647_v2, %v609_v37  ;;  %v664_v3 = vadd.f32 %v659_v62, %v622_v38  ;;  %v780_v38 = vmul.f32 %v779_v31, %v2061_v32 }
 0x19d   :  { %1272 = vrot.lane.b32.xlu1 %v2291_v41, %s1716_s10  ;;  %1331 = vrot.lane.b32.xlu0 %v2298_v42, %s1716_s10 }
 0x19e   :  { %v679_v9 = vadd.f32 %v677_v4, %v651_v0  ;;  %v684_v5 = vadd.f32 %v682_v8, %v664_v3  ;;  %v877_v0 = vstv %s1537_s13  ;;  %s2417_s13 = sld [smem:[#allocation8 + $0xf]] }
 0x19f   :  { %v661_v13 = vpop.permute.xlu1 %660  ;;  %v693_v7 = vpop.permute.xlu0 %692  ;;  %v879_v23 = vmul.f32 %v877_v0, %v2150_v26 }
 0x1a0   :  { %v665_v10 = vadd.f32 %v661_v13, %v623_v55  ;;  %v698_v21 = vadd.f32 %v693_v7, %v672_v50  ;;  %v786_v50 = vmul.f32 %v785_v40, %v2061_v32  ;;  %v878_v32 = vmul.f32 %v877_v0, %v2136_v19 }
 0x1a1   :  { %1333 = vrot.lane.b32.xlu1 %v2308_v47, %s1716_s10  ;;  %1388 = vrot.lane.b32.xlu0 %v2315_v17, %s1716_s10 }
 0x1a2   :  { %v685_v16 = vadd.f32 %v683_v15, %v665_v10 }
 0x1a3   :  { %v695_v52 = vpop.permute.xlu1 %694  ;;  %v707_v14 = vpop.permute.xlu0 %706 }
 0x1a4   :  { %v712_v54 = vadd.f32 %v707_v14, %v678_v1  ;;  %v699_v63 = vadd.f32 %v695_v52, %v673_v51 }
 0x1a5   :  { %1390 = vrot.lane.b32.xlu1 %v2324_v61, %s1716_s10  ;;  %s2407_s10 = sld [smem:[#allocation8 + $0x19]] }
 0x1a7   :  { %v709_v22 = vpop.permute.xlu1 %708  ;;  %v735_v36 = vpop.permute.xlu0 %734 }
 0x1a8   :  { %v713_v24 = vadd.f32 %v709_v22, %v679_v9  ;;  %v740_v18 = vadd.f32 %v735_v36, %v698_v21  ;;  %v889_v36 = vstv %s2344_s4  ;;  %s2422_s4 = sld [smem:[#allocation8 + $0x18]] }
 0x1a9   :  { %v891_v40 = vmul.f32 %v889_v36, %v2150_v26 }
 0x1aa   :  { %v776_v56 = vadd.f32 %v774_v25, %v740_v18 }
 0x1ab   :  { %v737_v30 = vpop.permute.xlu1 %736  ;;  %v721_v27 = vpop.permute.xlu0 %720 }
 0x1ac   :  { %v741_v28 = vadd.f32 %v737_v30, %v699_v63  ;;  %v726_v39 = vadd.f32 %v721_v27, %v684_v5 }
 0x1ae   :  { %v777_v33 = vadd.f32 %v775_v11, %v741_v28  ;;  %v890_v11 = vmul.f32 %v889_v36, %v2136_v19 }
 0x1af   :  { %v723_v12 = vpop.permute.xlu1 %722  ;;  %v749_v34 = vpop.permute.xlu0 %748 }
 0x1b0   :  { %v754_v37 = vadd.f32 %v749_v34, %v712_v54  ;;  %v727_v51 = vadd.f32 %v723_v12, %v685_v16  ;;  %v883_v16 = vstv %s1538_s3  ;;  %s2419_s3 = sld [smem:[#allocation8 + $0xe]] }
 0x1b1   :  { %v884_v22 = vmul.f32 %v883_v16, %v2136_v19  ;;  %v885_v28 = vmul.f32 %v883_v16, %v2150_v26 }
 0x1b2   :  { %v782_v43 = vadd.f32 %v780_v38, %v754_v37 }
 0x1b3   :  { %v751_v45 = vpop.permute.xlu1 %750  ;;  %v763_v44 = vpop.permute.xlu0 %762 }
 0x1b4   :  { %v755_v46 = vadd.f32 %v751_v45, %v713_v24  ;;  %v768_v48 = vadd.f32 %v763_v44, %v726_v39  ;;  %v981_v44 = vstv %s1546_s14  ;;  %s2424_s14 = sld [smem:[#allocation8 + $0x17]] }
 0x1b6   :  { %v783_v57 = vadd.f32 %v781_v49, %v755_v46  ;;  %v788_v53 = vadd.f32 %v786_v50, %v768_v48  ;;  %v982_v50 = vmul.f32 %v981_v44, %v2211_v6 }
 0x1b7   :  { %v765_v55 = vpop.permute.xlu1 %764  ;;  %v797_v58 = vpop.permute.xlu0 %796 }
 0x1b8   :  { %v769_v59 = vadd.f32 %v765_v55, %v727_v51  ;;  %v802_v3 = vadd.f32 %v797_v58, %v776_v56  ;;  %v983_v58 = vmul.f32 %v981_v44, %v2223_v29 }
 0x1ba   :  { %v789_v1 = vadd.f32 %v787_v60, %v769_v59  ;;  %v987_v59 = vstv %s2352_s15  ;;  %s2427_s15 = sld [smem:[#allocation8 + $0x8]] }
 0x1bb   :  { %v799_v2 = vpop.permute.xlu1 %798  ;;  %v811_v62 = vpop.permute.xlu0 %810 }
 0x1bc   :  { %v803_v5 = vadd.f32 %v799_v2, %v777_v33  ;;  %v816_v52 = vadd.f32 %v811_v62, %v782_v43 }
 0x1bf   :  { %v813_v4 = vpop.permute.xlu1 %812  ;;  %v839_v8 = vpop.permute.xlu0 %838 }
 0x1c0   :  { %v844_v9 = vadd.f32 %v839_v8, %v802_v3  ;;  %v817_v24 = vadd.f32 %v813_v4, %v783_v57  ;;  %v988_v3 = vmul.f32 %v987_v59, %v2211_v6  ;;  %v993_v4 = vstv %s2355_s16  ;;  %s2429_s16 = sld [smem:[#allocation8 + $0x11]] }
 0x1c2   :  { %v880_v13 = vadd.f32 %v878_v32, %v844_v9 }
 0x1c3   :  { %v841_v7 = vpop.permute.xlu1 %840  ;;  %v825_v10 = vpop.permute.xlu0 %824 }
 0x1c4   :  { %v845_v15 = vadd.f32 %v841_v7, %v803_v5  ;;  %v830_v18 = vadd.f32 %v825_v10, %v788_v53 }
 0x1c6   :  { %v881_v14 = vadd.f32 %v879_v23, %v845_v15  ;;  %v989_v15 = vmul.f32 %v987_v59, %v2223_v29  ;;  %v994_v23 = vmul.f32 %v993_v4, %v2211_v6  ;;  %v1218_v59 = vstv %s2427_s15 }
 0x1c7   :  { %v827_v54 = vpop.permute.xlu1 %826  ;;  %v853_v20 = vpop.permute.xlu0 %852 }
 0x1c8   :  { %v858_v21 = vadd.f32 %v853_v20, %v816_v52  ;;  %v831_v31 = vadd.f32 %v827_v54, %v789_v1 }
 0x1ca   :  { %v886_v25 = vadd.f32 %v884_v22, %v858_v21  ;;  %v995_v21 = vmul.f32 %v993_v4, %v2223_v29  ;;  %v1104_v22 = vstv %s2359_s17  ;;  %v1092_v29 = vstv %s2367_s20  ;;  %s1717_s17 = smov 4  }
 0x1cb   :  { %v855_v63 = vpop.permute.xlu1 %854  ;;  %v867_v56 = vpop.permute.xlu0 %866 }
 0x1cc   :  { %v859_v30 = vadd.f32 %v855_v63, %v817_v24  ;;  %v872_v27 = vadd.f32 %v867_v56, %v830_v18  ;;  %v1158_v24 = vstv %s2362_s18  ;;  %v1212_v18 = vstv %s2364_s19  ;;  %s1718_s18 = smov 3   ;;  %s1720_s19 = smov [#allocation12]  }
 0x1cd   :  { %v1098_v56 = vstv %s2369_s2  ;;  %s1451_s20 = sshll.u32 %s1720_s19, 4  ;;  %s1452_s20 = int_to_ptr.vmem [resolvable:$true] %s1451_s20 }
 0x1ce   :  { %v887_v33 = vadd.f32 %v885_v28, %v859_v30  ;;  %v892_v12 = vadd.f32 %v890_v11, %v872_v27  ;;  %v1152_v30 = vstv %s2373_s21  ;;  %v1206_v27 = vstv %s2375_s22  ;;  %s1653_s2 = scalar_lea.vmem %s1452_s20, 384  ;;  %p1658_p7 = scmp.lt.s32.totalorder %s1452_s20, %s1452_s20 }
 0x1cf   :  { %v869_v34 = vpop.permute.xlu1 %868  ;;  %v901_v37 = vpop.permute.xlu0 %900  ;;  %v1116_v28 = vstv %s2377_s23  ;;  %v1094_v11 = vstv %s2382_s8  ;;  %p1654_p6 = scmp.ne.s32.totalorder %s1452_s20, %s1653_s2  ;;  %p1659_p8 = scmp.lt.s32.totalorder %s1653_s2, %s1653_s2 }
 0x1d0   :  { %v873_v38 = vadd.f32 %v869_v34, %v831_v31  ;;  %v906_v46 = vadd.f32 %v901_v37, %v880_v13  ;;  %v1134_v31 = vstv %s2379_s24  ;;  %v1224_v34 = vstv %s2389_s27 }
 0x1d1   :  { %v1096_v37 = vstv %s2393_s28  ;;  %p1660_p9 = por %p1659_p8, %p1658_p7 }
 0x1d2   :  { %v893_v39 = vadd.f32 %v891_v40, %v873_v38  ;;  %v1140_v38 = vstv %s2395_s29 }
 0x1d3   :  { %v903_v43 = vpop.permute.xlu1 %902  ;;  %v915_v45 = vpop.permute.xlu0 %914  ;;  %p1661_p10 = pnand %p1660_p9, %p1654_p6 }
 0x1d4   :  { %v907_v51 = vadd.f32 %v903_v43, %v881_v14  ;;  %v920_v60 = vadd.f32 %v915_v45, %v886_v25  ;;  %v1128_v43 = vstv %s2399_s30  ;;  %v1146_v45 = vstv %s2405_s9 }
 0x1d7   :  { %v917_v48 = vpop.permute.xlu1 %916  ;;  %v943_v49 = vpop.permute.xlu0 %942 }
 0x1d8   :  { %v948_v19 = vadd.f32 %v943_v49, %v906_v46  ;;  %v921_v8 = vadd.f32 %v917_v48, %v887_v33  ;;  %v1122_v33 = vstv %s2384_s25  ;;  %v1188_v48 = vstv %s2403_s7 }
 0x1d9   :  { %v1242_v49 = vstv %s2407_s10 }
 0x1da   :  { %v2357_v57 = vadd.f32 %v982_v50, %v948_v19  ;;  %v1176_v19 = vstv %s2409_s11  ;;  %v1194_v50 = vstv %s2413_s0 }
 0x1db   :  { %v945_v53 = vpop.permute.xlu1 %944  ;;  %v929_v26 = vpop.permute.xlu0 %928 }
 0x1dc   :  { %v949_v55 = vadd.f32 %v945_v53, %v907_v51  ;;  %v934_v9 = vadd.f32 %v929_v26, %v892_v12  ;;  %v1170_v12 = vstv %s2387_s26  ;;  %v1230_v53 = vstv %s2417_s13 }
 0x1dd   :  { %v1164_v26 = vstv %s2415_s12 }
 0x1de   :  { %v2371_v1 = vadd.f32 %v983_v58, %v949_v55  ;;  %v1182_v55 = vstv %s2419_s3  ;;  %v1248_v58 = vstv %s2422_s4 }
 0x1df   :  { %v931_v2 = vpop.permute.xlu1 %930  ;;  %v957_v62 = vpop.permute.xlu0 %956 }
 0x1e0   :  { %v962_v0 = vadd.f32 %v957_v62, %v920_v60  ;;  %v935_v16 = vadd.f32 %v931_v2, %v893_v39  ;;  %v1110_v39 = vstv %s2397_s1 }
 0x1e2   :  { %v2391_v32 = vadd.f32 %v988_v3, %v962_v0 }
 0x1e3   :  { %v959_v5 = vpop.permute.xlu1 %958  ;;  %v971_v13 = vpop.permute.xlu0 %970 }
 0x1e4   :  { %v963_v7 = vadd.f32 %v959_v5, %v921_v8  ;;  %v976_v10 = vadd.f32 %v971_v13, %v934_v9 }
 0x1e6   :  { %v991_v52 = vadd.f32 %v989_v15, %v963_v7  ;;  %v2411_v14 = vadd.f32 %v994_v23, %v976_v10 }
 0x1e7   :  { %v973_v6 = vpop.permute.xlu1 %972  ;;  %v1005_v54 = vpop.permute.xlu0 %1004 }
 0x1e8   :  { %v977_v20 = vadd.f32 %v973_v6, %v935_v16  ;;  %v1010_v40 = vadd.f32 %v1005_v54, %v2357_v57  ;;  %v1236_v57 = vstv %s2429_s16 }
 0x1ea   :  { %v2431_v36 = vadd.f32 %v995_v21, %v977_v20 }
 0x1eb   :  { %v1007_v25 = vpop.permute.xlu1 %1006  ;;  %v1019_v63 = vpop.permute.xlu0 %1018 }
 0x1ec   :  { %v1011_v2 = vadd.f32 %v1007_v25, %v2371_v1  ;;  %v1024_v4 = vadd.f32 %v1019_v63, %v2391_v32 }
 0x1ef   :  { %v1021_v44 = vpop.permute.xlu1 %1020  ;;  %v1047_v46 = vpop.permute.xlu0 %1046 }
 0x1f0   :  { %v1052_v51 = vadd.f32 %v1047_v46, %v1010_v40  ;;  %v1025_v8 = vadd.f32 %v1021_v44, %v991_v52 }
 0x1f2   :  { %v1099_v62 = vmul.f32 %v1098_v56, %v1052_v51  ;;  %v1117_v0 = vmul.f32 %v1116_v28, %v1052_v51  ;;  %v1135_v3 = vmul.f32 %v1134_v31, %v1052_v51  ;;  %1083 = vst.msk [vmem:[#allocation12] sm:$0xf] %vm1082_vm4, %v1052_v51  ;;  %v1105_v13 = vmul.f32 %v1104_v22, %v1052_v51 }
 0x1f3   :  { %v1049_v9 = vpop.permute.xlu1 %1048  ;;  %v1033_v5 = vpop.permute.xlu0 %1032  ;;  %v1123_v15 = vmul.f32 %v1122_v33, %v1052_v51  ;;  %v1141_v23 = vmul.f32 %v1140_v38, %v1052_v51  ;;  %v2470_v16 = vmul.f32 %v1110_v39, %v1052_v51  ;;  %v2475_v20 = vmul.f32 %v1128_v43, %v1052_v51 }
 0x1f4   :  { %v1053_v10 = vadd.f32 %v1049_v9, %v1011_v2  ;;  %v1038_v1 = vadd.f32 %v1033_v5, %v2411_v14  ;;  %v1101_v6 = vadd.f32 %v1099_v62, %v1092_v29  ;;  %v1119_v54 = vadd.f32 %v1117_v0, %v1094_v11 }
 0x1f5   :  { %v1137_v21 = vadd.f32 %v1135_v3, %v1096_v37  ;;  %v2484_v2 = vmul.f32 %v1146_v45, %v1052_v51 }
 0x1f6   :  { %v1100_v32 = vmul.f32 %v1098_v56, %v1053_v10  ;;  %v1118_v52 = vmul.f32 %v1116_v28, %v1053_v10  ;;  %v1136_v25 = vmul.f32 %v1134_v31, %v1053_v10  ;;  %1084 = vst.msk [vmem:[#allocation12 + $0xc] sm:$0xf] %vm1082_vm4, %v1053_v10  ;;  %v1106_v14 = vmul.f32 %v1104_v22, %v1053_v10 }
 0x1f7   :  { %v1035_v63 = vpop.permute.xlu1 %1034  ;;  %v1061_v40 = vpop.permute.xlu0 %1060  ;;  %v2480_v44 = vmul.f32 %v1122_v33, %v1053_v10  ;;  %v2482_v46 = vmul.f32 %v1140_v38, %v1053_v10  ;;  %v2489_v31 = vmul.f32 %v1110_v39, %v1053_v10  ;;  %v2491_v62 = vmul.f32 %v1128_v43, %v1053_v10 }
 0x1f8   :  { %v1039_v56 = vadd.f32 %v1035_v63, %v2431_v36  ;;  %v2487_v28 = vadd.f32 %v1061_v40, %v1024_v4  ;;  %v1102_v22 = vadd.f32 %v1100_v32, %v1092_v29  ;;  %v1120_v33 = vadd.f32 %v1118_v52, %v1094_v11 }
 0x1f9   :  { %v1138_v0 = vadd.f32 %v1136_v25, %v1096_v37  ;;  %v2495_v38 = vmul.f32 %v1146_v45, %v1053_v10 }
 0x1fa   :  { %v1159_v51 = vmul.f32 %v1158_v24, %v2487_v28  ;;  %v1153_v36 = vmul.f32 %v1152_v30, %v2487_v28  ;;  %v1171_v3 = vmul.f32 %v1170_v12, %v2487_v28  ;;  %v1189_v39 = vmul.f32 %v1188_v48, %v2487_v28  ;;  %1086 = vst.msk [vmem:[#allocation12 + $0x4] sm:$0xf] %vm1082_vm4, %v2487_v28 }
 0x1fb   :  { %v1063_v29 = vpop.permute.xlu1 %1062  ;;  %v1075_v11 = vpop.permute.xlu0 %1074  ;;  %v1177_v37 = vmul.f32 %v1176_v19, %v2487_v28  ;;  %v1195_v43 = vmul.f32 %v1194_v50, %v2487_v28  ;;  %v1165_v45 = vmul.f32 %v1164_v26, %v2487_v28  ;;  %v2523_v4 = vmul.f32 %v1182_v55, %v2487_v28 }
 0x1fc   :  { %v2525_v9 = vadd.f32 %v1063_v29, %v1025_v8  ;;  %v2527_v5 = vadd.f32 %v1075_v11, %v1038_v1  ;;  %v1161_v10 = vadd.f32 %v1159_v51, %v1105_v13  ;;  %v1155_v32 = vadd.f32 %v1153_v36, %v1101_v6 }
 0x1fd   :  { %v1173_v52 = vadd.f32 %v1171_v3, %v1119_v54  ;;  %v1191_v25 = vadd.f32 %v1189_v39, %v1137_v21  ;;  %v1179_v63 = vadd.f32 %v1177_v37, %v1123_v15  ;;  %v1197_v40 = vadd.f32 %v1195_v43, %v1141_v23 }
 0x1fe   :  { %v1213_v7 = vmul.f32 %v1212_v18, %v2527_v5  ;;  %v1160_v60 = vmul.f32 %v1158_v24, %v2525_v9  ;;  %v1207_v8 = vmul.f32 %v1206_v27, %v2527_v5  ;;  %v1154_v1 = vmul.f32 %v1152_v30, %v2525_v9  ;;  %1087 = vst.msk [vmem:[#allocation12 + $0x10] sm:$0xf] %vm1082_vm4, %v2525_v9 }
 0x1ff   :  { %1089 = vst.msk [vmem:[#allocation12 + $0x8] sm:$0xf] %vm1082_vm4, %v2527_v5  ;;  %v1077_v13 = vpop.permute.xlu1 %1076  ;;  %v1225_v15 = vmul.f32 %v1224_v34, %v2527_v5  ;;  %v1172_v24 = vmul.f32 %v1170_v12, %v2525_v9  ;;  %v1243_v23 = vmul.f32 %v1242_v49, %v2527_v5  ;;  %v1190_v30 = vmul.f32 %v1188_v48, %v2525_v9  ;;  %v2557_v6 = vpop.permute.xlu0 %1259 }
 0x200   :  { %v1081_v54 = vadd.f32 %v1077_v13, %v1039_v56  ;;  %v1215_v21 = vadd.f32 %v1213_v7, %v1161_v10  ;;  %v1162_v51 = vadd.f32 %v1160_v60, %v1106_v14  ;;  %v1209_v36 = vadd.f32 %v1207_v8, %v1155_v32 }
 0x201   :  { %v1156_v3 = vadd.f32 %v1154_v1, %v1102_v22  ;;  %v1227_v39 = vadd.f32 %v1225_v15, %v1173_v52  ;;  %v1174_v12 = vadd.f32 %v1172_v24, %v1120_v33  ;;  %v2559_v29 = vadd.f32 %v1243_v23, %v1191_v25 }
 0x202   :  { %1294 = vrot.lane.b32.xlu0 %v1215_v21, %s1717_s17  ;;  %v1214_v48 = vmul.f32 %v1212_v18, %v1081_v54  ;;  %v1208_v11 = vmul.f32 %v1206_v27, %v1081_v54  ;;  %v1226_v56 = vmul.f32 %v1224_v34, %v1081_v54  ;;  %v1192_v7 = vadd.f32 %v1190_v30, %v1138_v0 }
 0x203   :  { %1090 = vst.msk [vmem:[#allocation12 + $0x14] sm:$0xf] %vm1082_vm4, %v1081_v54  ;;  %v1244_v60 = vmul.f32 %v1242_v49, %v1081_v54  ;;  %v1231_v14 = vmul.f32 %v1230_v53, %v2527_v5  ;;  %v1178_v22 = vmul.f32 %v1176_v19, %v2525_v9  ;;  %v1232_v33 = vmul.f32 %v1230_v53, %v1081_v54  ;;  %v1262_v18 = vpop.permute.xlu1 %1261  ;;  %v1321_v37 = vpop.permute.xlu0 %1320 }
 0x204   :  { %v1216_v27 = vadd.f32 %v1214_v48, %v1162_v51  ;;  %v1210_v43 = vadd.f32 %v1208_v11, %v1156_v3  ;;  %v1228_v34 = vadd.f32 %v1226_v56, %v1174_v12  ;;  %v1249_v0 = vmul.f32 %v1248_v58, %v2527_v5 }
 0x205   :  { %v1246_v49 = vadd.f32 %v1244_v60, %v1192_v7  ;;  %v1233_v10 = vadd.f32 %v1231_v14, %v1179_v63  ;;  %v1180_v32 = vadd.f32 %v1178_v22, %v2480_v44  ;;  %v1196_v19 = vmul.f32 %v1194_v50, %v2525_v9 }
 0x206   :  { %1296 = vrot.lane.b32.xlu1 %v1216_v27, %s1717_s17  ;;  %1281 = vrot.lane.b32.xlu0 %v1209_v36, %s1718_s18  ;;  %v1251_v53 = vadd.f32 %v1249_v0, %v1197_v40  ;;  %v1250_v52 = vmul.f32 %v1248_v58, %v1081_v54  ;;  %v1167_v25 = vadd.f32 %v1165_v45, %v2470_v16 }
 0x207   :  { %v1234_v63 = vadd.f32 %v1232_v33, %v1180_v32  ;;  %v1198_v44 = vadd.f32 %v1196_v19, %v2482_v46  ;;  %v1219_v50 = vmul.f32 %v1218_v59, %v2527_v5  ;;  %v1166_v8 = vmul.f32 %v1164_v26, %v2525_v9  ;;  %v1323_v1 = vpop.permute.xlu1 %1322  ;;  %v1378_v13 = vpop.permute.xlu0 %1377 }
 0x208   :  { %v1220_v40 = vmul.f32 %v1218_v59, %v1081_v54  ;;  %v1185_v58 = vadd.f32 %v2523_v4, %v2475_v20  ;;  %v1237_v16 = vmul.f32 %v1236_v57, %v2527_v5  ;;  %v1184_v46 = vmul.f32 %v1182_v55, %v2525_v9 }
 0x209   :  { %v1252_v45 = vadd.f32 %v1250_v52, %v1198_v44  ;;  %v1221_v15 = vadd.f32 %v1219_v50, %v1167_v25  ;;  %v1168_v26 = vadd.f32 %v1166_v8, %v2489_v31  ;;  %v1238_v24 = vmul.f32 %v1236_v57, %v1081_v54 }
 0x20a   :  { %1283 = vrot.lane.b32.xlu1 %v1210_v43, %s1718_s18  ;;  %1341 = vrot.lane.b32.xlu0 %v1227_v39, %s1718_s18  ;;  %v1239_v59 = vadd.f32 %v1237_v16, %v1185_v58  ;;  %v1186_v20 = vadd.f32 %v1184_v46, %v2491_v62  ;;  %v2711_v4 = vstv %s2424_s14  ;;  %v2712_v55 = vstv %s2440_s5  ;;  %s1719_s5 = smov 2  }
 0x20b   :  { %v1201_v23 = vmul.f32 %v2711_v4, %v2487_v28  ;;  %v1222_v30 = vadd.f32 %v1220_v40, %v1168_v26  ;;  %v1255_v21 = vmul.f32 %v2712_v55, %v2527_v5  ;;  %v2713_v51 = vmov %v2711_v4  ;;  %v1380_v3 = vpop.permute.xlu1 %1379  ;;  %v1271_v12 = vpop.permute.xlu0 %1270 }
 0x20c   :  { %v1202_v31 = vmul.f32 %v2713_v51, %v2525_v9  ;;  %v2714_v36 = vmov %v2712_v55  ;;  %v1240_v48 = vadd.f32 %v1238_v24, %v1186_v20  ;;  %v1265_v62 = vadd.f32 %v2282_v35, %v2557_v6 }
 0x20d   :  { %v1256_v57 = vmul.f32 %v2714_v36, %v1081_v54  ;;  %v1203_v39 = vadd.f32 %v1201_v23, %v2484_v2  ;;  %v1266_v28 = vadd.f32 %v2291_v41, %v1262_v18  ;;  %v1326_v56 = vadd.f32 %v2298_v42, %v1321_v37 }
 0x20e   :  { %v1204_v11 = vadd.f32 %v1202_v31, %v2495_v38  ;;  %v1327_v5 = vadd.f32 %v2308_v47, %v1323_v1  ;;  %v1383_v9 = vadd.f32 %v2315_v17, %v1378_v13  ;;  %1343 = vrot.lane.b32.xlu1 %v1228_v34, %s1718_s18  ;;  %1398 = vrot.lane.b32.xlu0 %v2559_v29, %s1718_s18 }
 0x20f   :  { %v1257_v54 = vadd.f32 %v1255_v21, %v1203_v39  ;;  %1268 = vst.msk [vmem:[#allocation11] sm:$0xf] %vm1267_vm5, %v1265_v62  ;;  %1269 = vst.msk [vmem:[#allocation11 + $0xc] sm:$0xf] %vm1267_vm5, %v1266_v28  ;;  %v1384_v35 = vadd.f32 %v2324_v61, %v1380_v3  ;;  %v1273_v42 = vpop.permute.xlu1 %1272  ;;  %v1332_v47 = vpop.permute.xlu0 %1331 }
 0x210   :  { %v1258_v41 = vadd.f32 %v1256_v57, %v1204_v11  ;;  %1329 = vst.msk [vmem:[#allocation11 + $0x4] sm:$0xf] %vm1267_vm5, %v1326_v56  ;;  %1330 = vst.msk [vmem:[#allocation11 + $0x10] sm:$0xf] %vm1267_vm5, %v1327_v5 }
 0x211   :  { %1386 = vst.msk [vmem:[#allocation11 + $0x8] sm:$0xf] %vm1267_vm5, %v1383_v9  ;;  %1387 = vst.msk [vmem:[#allocation11 + $0x14] sm:$0xf] %vm1267_vm5, %v1384_v35 }
 0x212   :  { %1277 = vst.msk [vmem:[#allocation11] sm:$0xf] %vm1276_vm6, %v1271_v12  ;;  %1278 = vst.msk [vmem:[#allocation11 + $0xc] sm:$0xf] %vm1276_vm6, %v1273_v42  ;;  %1400 = vrot.lane.b32.xlu1 %v1246_v49, %s1718_s18  ;;  %1353 = vrot.lane.b32.xlu0 %v1233_v10, %s1717_s17 }
 0x213   :  { %1337 = vst.msk [vmem:[#allocation11 + $0x4] sm:$0xf] %vm1276_vm6, %v1332_v47  ;;  %v1334_v17 = vpop.permute.xlu1 %1333  ;;  %v1389_v61 = vpop.permute.xlu0 %1388 }
 0x214   :  { %1338 = vst.msk [vmem:[#allocation11 + $0x10] sm:$0xf] %vm1276_vm6, %v1334_v17  ;;  %1394 = vst.msk [vmem:[#allocation11 + $0x8] sm:$0xf] %vm1276_vm6, %v1389_v61 }
 0x216   :  { %1355 = vrot.lane.b32.xlu1 %v1234_v63, %s1717_s17  ;;  %1410 = vrot.lane.b32.xlu0 %v1251_v53, %s1717_s17 }
 0x217   :  { %v1391_v2 = vpop.permute.xlu1 %1390 }
 0x218   :  { %1395 = vst.msk [vmem:[#allocation11 + $0x14] sm:$0xf] %vm1276_vm6, %v1391_v2 }
 0x21a   :  { %1412 = vrot.lane.b32.xlu1 %v1252_v45, %s1717_s17  ;;  %1309 = vrot.lane.b32.xlu0 %v1221_v15, %s1719_s5 }
 0x21e   :  { %1311 = vrot.lane.b32.xlu1 %v1222_v30, %s1719_s5  ;;  %1367 = vrot.lane.b32.xlu0 %v1239_v59, %s1719_s5 }
 0x21f   :  { %1664 = shalt.err (!%p1661_p10)
}
 0x220   :  { %s1665_s23 = scalar_lea.hbm %s2708_s6, 384 }
 0x221   :  { %p1666_p11 = scmp.ne.s32.totalorder %s2708_s6, %s1665_s23  ;;  %p1669_p12 = scmp.lt.u32.totalorder %s1665_s23, %s2708_s6 }
 0x223   :  { %p1671_p13 = pnand %p1669_p12, %p1666_p11 }
 0x225   :  { %1674 = shalt.err (!%p1671_p13)
}
 0x226   :  { %s1721_s27 = smov 64   ;;  %1369 = vrot.lane.b32.xlu1 %v1240_v48, %s1719_s5  ;;  %1424 = vrot.lane.b32.xlu0 %v1257_v54, %s1719_s5  ;;  %vm1287_vm7 = vcmask 68632   ;;  %vm1302_vm8 = vcmask 68640   ;;  %vm1317_vm9 = vcmask 60440  }
 0x227   :  { %1457 = dma.vmem_to_hbm [thread:$0]  %s1452_s20, 384, %s2708_s6, [#allocation13], %s1721_s27, %s1721_s27, %s1717_s17  }
 0x228   :  { %s1722_s6 = smov [#allocation11]  }
 0x229   :  { %s1439_s1 = sshll.u32 %s1722_s6, 4  ;;  %s1440_s1 = int_to_ptr.vmem [resolvable:$true] %s1439_s1 }
 0x22a   :  { %1426 = vrot.lane.b32.xlu1 %v1258_v41, %s1719_s5  ;;  %s1675_s30 = scalar_lea.vmem %s1440_s1, 384  ;;  %p1680_p1 = scmp.lt.s32.totalorder %s1440_s1, %s1440_s1 }
 0x22b   :  { %p1676_p0 = scmp.ne.s32.totalorder %s1440_s1, %s1675_s30  ;;  %p1681_p2 = scmp.lt.s32.totalorder %s1675_s30, %s1675_s30 }
 0x22d   :  { %p1682_p3 = por %p1681_p2, %p1680_p1 }
 0x22f   :  { %p1683_p4 = pnand %p1682_p3, %p1676_p0 }
 0x274   :  { %v1295_v38 = vpop.permute.xlu0 %1294 }
 0x278   :  { %v1297_v6 = vpop.permute.xlu1 %1296  ;;  %v1282_v29 = vpop.permute.xlu0 %1281 }
 0x279   :  { %1288 = vst.msk [vmem:[#allocation11] sm:$0xf] %vm1287_vm7, %v1282_v29 }
 0x27c   :  { %v1284_v7 = vpop.permute.xlu1 %1283  ;;  %v1342_v60 = vpop.permute.xlu0 %1341 }
 0x27d   :  { %1289 = vst.msk [vmem:[#allocation11 + $0xc] sm:$0xf] %vm1287_vm7, %v1284_v7  ;;  %1347 = vst.msk [vmem:[#allocation11 + $0x4] sm:$0xf] %vm1287_vm7, %v1342_v60 }
 0x280   :  { %v1290_v14 = vld [vmem:[#allocation11] sm:$0xf]  ;;  %v1344_v22 = vpop.permute.xlu1 %1343  ;;  %v1399_v33 = vpop.permute.xlu0 %1398 }
 0x281   :  { %v1300_v18 = vadd.f32 %v1295_v38, %v1290_v14  ;;  %1348 = vst.msk [vmem:[#allocation11 + $0x10] sm:$0xf] %vm1287_vm7, %v1344_v22  ;;  %1404 = vst.msk [vmem:[#allocation11 + $0x8] sm:$0xf] %vm1287_vm7, %v1399_v33 }
 0x283   :  { %1303 = vst.msk [vmem:[#allocation11] sm:$0xf] %vm1302_vm8, %v1300_v18 }
 0x284   :  { %v1291_v37 = vld [vmem:[#allocation11 + $0xc] sm:$0xf]  ;;  %v1401_v27 = vpop.permute.xlu1 %1400  ;;  %v1349_v43 = vld [vmem:[#allocation11 + $0x4] sm:$0xf]  ;;  %v1354_v34 = vpop.permute.xlu0 %1353 }
 0x285   :  { %v1301_v0 = vadd.f32 %v1297_v6, %v1291_v37  ;;  %1405 = vst.msk [vmem:[#allocation11 + $0x14] sm:$0xf] %vm1287_vm7, %v1401_v27  ;;  %v1359_v49 = vadd.f32 %v1354_v34, %v1349_v43 }
 0x287   :  { %1304 = vst.msk [vmem:[#allocation11 + $0xc] sm:$0xf] %vm1302_vm8, %v1301_v0  ;;  %1361 = vst.msk [vmem:[#allocation11 + $0x4] sm:$0xf] %vm1302_vm8, %v1359_v49 }
 0x288   :  { %v1350_v10 = vld [vmem:[#allocation11 + $0x10] sm:$0xf]  ;;  %v1356_v32 = vpop.permute.xlu1 %1355  ;;  %v1406_v19 = vld [vmem:[#allocation11 + $0x8] sm:$0xf]  ;;  %v1411_v53 = vpop.permute.xlu0 %1410 }
 0x289   :  { %v1360_v52 = vadd.f32 %v1356_v32, %v1350_v10  ;;  %v1416_v25 = vadd.f32 %v1411_v53, %v1406_v19 }
 0x28a   :  { %v1305_v50 = vld [vmem:[#allocation11] sm:$0xf] }
 0x28b   :  { %1362 = vst.msk [vmem:[#allocation11 + $0x10] sm:$0xf] %vm1302_vm8, %v1360_v52  ;;  %1418 = vst.msk [vmem:[#allocation11 + $0x8] sm:$0xf] %vm1302_vm8, %v1416_v25 }
 0x28c   :  { %v1407_v63 = vld [vmem:[#allocation11 + $0x14] sm:$0xf]  ;;  %v1413_v44 = vpop.permute.xlu1 %1412  ;;  %v1310_v8 = vpop.permute.xlu0 %1309 }
 0x28d   :  { %v1417_v1 = vadd.f32 %v1413_v44, %v1407_v63  ;;  %v1315_v13 = vadd.f32 %v1310_v8, %v1305_v50 }
 0x28e   :  { %v1306_v40 = vld [vmem:[#allocation11 + $0xc] sm:$0xf]  ;;  %v1363_v16 = vld [vmem:[#allocation11 + $0x4] sm:$0xf] }
 0x28f   :  { %1419 = vst.msk [vmem:[#allocation11 + $0x14] sm:$0xf] %vm1302_vm8, %v1417_v1 }
 0x290   :  { %1318 = vst.msk [vmem:[#allocation11] sm:$0xf] %vm1317_vm9, %v1315_v13  ;;  %v1312_v58 = vpop.permute.xlu1 %1311  ;;  %v1368_v46 = vpop.permute.xlu0 %1367 }
 0x291   :  { %v1316_v45 = vadd.f32 %v1312_v58, %v1306_v40  ;;  %v1373_v15 = vadd.f32 %v1368_v46, %v1363_v16 }
 0x292   :  { %v1364_v26 = vld [vmem:[#allocation11 + $0x10] sm:$0xf]  ;;  %v1420_v59 = vld [vmem:[#allocation11 + $0x8] sm:$0xf] }
 0x293   :  { %1319 = vst.msk [vmem:[#allocation11 + $0xc] sm:$0xf] %vm1317_vm9, %v1316_v45  ;;  %1375 = vst.msk [vmem:[#allocation11 + $0x4] sm:$0xf] %vm1317_vm9, %v1373_v15 }
 0x296   :  { %v1421_v30 = vld [vmem:[#allocation11 + $0x14] sm:$0xf] }
 0x298   :  { %v1370_v24 = vpop.permute.xlu1 %1369  ;;  %v1425_v20 = vpop.permute.xlu0 %1424 }
 0x299   :  { %v1374_v4 = vadd.f32 %v1370_v24, %v1364_v26  ;;  %v1430_v23 = vadd.f32 %v1425_v20, %v1420_v59 }
 0x29b   :  { %1376 = vst.msk [vmem:[#allocation11 + $0x10] sm:$0xf] %vm1317_vm9, %v1374_v4  ;;  %1432 = vst.msk [vmem:[#allocation11 + $0x8] sm:$0xf] %vm1317_vm9, %v1430_v23 }
 0x29c   :  { %v1427_v55 = vpop.permute.xlu1 %1426 }
 0x29d   :  { %v1431_v21 = vadd.f32 %v1427_v55, %v1421_v30 }
 0x29f   :  { %1433 = vst.msk [vmem:[#allocation11 + $0x14] sm:$0xf] %vm1317_vm9, %v1431_v21 }
 0x2a0   :  { %1686 = shalt.err (!%p1683_p4)
}
 0x2a1   :  { %s2715_s10 = sld [smem:[#allocation19_spill]] }
 0x2a7   :  { %s1687_s11 = scalar_lea.hbm %s2715_s10, 384 }
 0x2a8   :  { %p1688_p5 = scmp.ne.s32.totalorder %s2715_s10, %s1687_s11  ;;  %p1691_p6 = scmp.lt.u32.totalorder %s1687_s11, %s2715_s10 }
 0x2aa   :  { %p1693_p7 = pnand %p1691_p6, %p1688_p5 }
 0x2ac   :  { %1696 = shalt.err (!%p1693_p7)
}
 0x2ad   :  { %1445 = dma.vmem_to_hbm [thread:$0]  %s1440_s1, 384, %s2715_s10, [#allocation4], %s1721_s27, %s1721_s27, %s1717_s17  }
 0x2ae   :  { %1703 = dma.done.wait [#allocation4], 384  }
 0x2af   :  { %1704 = vsyncadd [#allocation4], 4294966912 }
 0x2b0   :  { %1705 = dma.done.wait [#allocation13], 384  }
 0x2b1   :  { %1706 = vsyncadd [#allocation13], 4294966912 }
 0x2b2   :  { %1464 = vsyncpa [#allocation4], 1 }
 0x2b3   :  { %1465 = vsyncpa [#allocation13], 1 }
 0x2b4   :  { %1466 = vsyncpa [#allocation5], 1 }
 0x2b5   :  { %1467 = vsyncpa [#allocation7], 1 }
 0x2b6   :  { %1468 = vsyncpa [#allocation10], 1 }

</bundles_post_ra>
